<compile_context>
chip_gen: v5e
topology: v5e:2x2
jax: 0.10.0
libtpu: 0.0.40
codegen_flags: <defaults>
</compile_context>

<pallas_src>
import math

import jax
import jax.numpy as jnp
from jax.experimental import pallas as pl
from jax.experimental.pallas import tpu as pltpu

COMPONENT_DIM = 128     # component_dim (module default)
EMBEDDING_DIM = 768     # embedding_dim (module default)
NUM_HEADS = 4
NUM_COMPONENTS = 5      # device, pseudo, attribute, value, unit


def _round_up(x, m):
    return ((x + m - 1) // m) * m


# ---------------------------------------------------------------------------
# Pallas kernel: one batch tile of `tb` component dicts.
# ---------------------------------------------------------------------------
def _compose_kernel(x_ref, wqkv_ref, bqkv_ref, seg_ref, wf_ref, bf_ref,
                    out_ref):
    # x_ref: (S, tb, C) bf16, component-major so x_ref[s] is a clean (tb, C)
    # slab (no sublane gathers, no reshapes).
    S = x_ref.shape[0]
    C = wqkv_ref.shape[0]

    wqkv = wqkv_ref[...]    # (C, 3C) bf16; Q columns pre-scaled by 1/sqrt(Dh)
    bqkv = bqkv_ref[...]    # (1, 3C) f32
    seg = seg_ref[...]      # (C, C) bf16 block-diagonal per-head mask

    # Fused QKV projection per component: (tb, C) @ (C, 3C), M = tb.
    q, k, v = [], [], []
    for s in range(S):
        qkv = jnp.dot(x_ref[s], wqkv,
                      preferred_element_type=jnp.float32) + bqkv      # (tb, 3C)
        q.append(qkv[:, 0 * C:1 * C])
        k.append(qkv[:, 1 * C:2 * C])
        v.append(qkv[:, 2 * C:3 * C])

    # Attention.  (q_i * k_j) @ seg gives the per-head dot product broadcast
    # across that head's 32 lanes, so everything below is lane-wise.
    inv_s = 1.0 / S
    wkey = [None] * S       # query-averaged attention weight per key component
    for i in range(S):
        row = []
        for j in range(S):
            prod = (q[i] * k[j]).astype(jnp.bfloat16)
            row.append(jnp.dot(prod, seg,
                               preferred_element_type=jnp.float32))   # (tb, C)
        m = row[0]
        for j in range(1, S):
            m = jnp.maximum(m, row[j])
        e = [jnp.exp(row[j] - m) for j in range(S)]
        z = e[0]
        for j in range(1, S):
            z = z + e[j]
        r = pl.reciprocal(z, approx=True) * inv_s
        for j in range(S):
            p = e[j] * r
            wkey[j] = p if wkey[j] is None else wkey[j] + p

    # composed = mean over queries of the multi-head attention output,
    # still in component space (heads interleaved along the lane axis).
    comp = wkey[0] * v[0]
    for j in range(1, S):
        comp = comp + wkey[j] * v[j]

    # Fused MHA out_proj + mean + output_projection (precomputed on host).
    out = jnp.dot(comp.astype(jnp.bfloat16), wf_ref[...],
                  preferred_element_type=jnp.float32) + bf_ref[...]   # (tb, E)
    out_ref[...] = out.astype(out_ref.dtype)


# ---------------------------------------------------------------------------
# Wrapper: host-side algebraic fusion + batch tiling + pallas_call
# ---------------------------------------------------------------------------
def compositional_embedding_forward(x_stack, wqkv_t, bqkv, wo_t, bo,
                                    wout_t, bout, *, block_b=256):
    """x_stack: (B, S, C) float32 -> (B, E) float32."""
    B, S, C = x_stack.shape
    E = wout_t.shape[1]
    Dh = C // NUM_HEADS
    scale = 1.0 / math.sqrt(Dh)

    # ---- host-side algebraic prep (tiny, done once) ------------------------
    # Fold the attention scale into the Q projection (exact reformulation).
    wqkv_s = wqkv_t.at[:, :C].multiply(scale)
    bqkv_s = bqkv.at[:, :C].multiply(scale)
    # Fuse out_proj + mean + output_projection:
    #   mean_s(attn @ WoT + bo) @ WoutT + bout
    #     == mean_s(attn) @ (WoT @ WoutT) + (bo @ WoutT + bout).
    w_fused = wo_t @ wout_t                                   # (C, E)
    b_fused = bo @ wout_t + bout                              # (1, E)
    # Block-diagonal per-head "ones": (x @ seg)[b, l] = sum of x[b, :] over the
    # Dh-lane head segment containing lane l (segmented reduce + broadcast).
    lane = jnp.arange(C)
    seg = (lane[:, None] // Dh == lane[None, :] // Dh).astype(jnp.bfloat16)

    # bf16 MXU operands / half the HBM traffic; accumulation stays f32.
    x_sbc = jnp.transpose(x_stack, (1, 0, 2)).astype(jnp.bfloat16)    # (S, B, C)
    wqkv_bf = wqkv_s.astype(jnp.bfloat16)
    wf_bf = w_fused.astype(jnp.bfloat16)

    # ---- batch tiling -------------------------------------------------------
    tb = max(8, min(_round_up(block_b, 8), _round_up(B, 8)))
    b_pad = _round_up(B, tb)
    if b_pad != B:
        x_sbc = jnp.pad(x_sbc, ((0, 0), (0, b_pad - B), (0, 0)))

    out = pl.pallas_call(
        _compose_kernel,
        out_shape=jax.ShapeDtypeStruct((b_pad, E), jnp.float32),
        grid=(b_pad // tb,),
        in_specs=[
            pl.BlockSpec((S, tb, C), lambda i: (0, i, 0)),    # stacked components
            pl.BlockSpec((C, 3 * C), lambda i: (0, 0)),       # fused QKV weight
            pl.BlockSpec((1, 3 * C), lambda i: (0, 0)),       # fused QKV bias
            pl.BlockSpec((C, C), lambda i: (0, 0)),           # head-segment mask
            pl.BlockSpec((C, E), lambda i: (0, 0)),           # fused output weight
            pl.BlockSpec((1, E), lambda i: (0, 0)),           # fused output bias
        ],
        out_specs=pl.BlockSpec((tb, E), lambda i: (i, 0)),
        compiler_params=pltpu.CompilerParams(
            dimension_semantics=("parallel",)),
    )(x_sbc, wqkv_bf, bqkv_s, seg, wf_bf, b_fused)
    return out[:B]


# ---------------------------------------------------------------------------
# Parameter init (deterministic, mirrors the module's __init__ shapes)
# ---------------------------------------------------------------------------
def _xavier_uniform(key, shape):
    fan_out, fan_in = shape[0], shape[1]
    limit = math.sqrt(6.0 / (fan_in + fan_out))
    return jax.random.uniform(key, shape, jnp.float32, -limit, limit)


def init_params(key, C=COMPONENT_DIM, E=EMBEDDING_DIM):
    ks = jax.random.split(key, 12)
    return {
        # nn.Embedding tables, normal(std=0.02)
        "device_emb": 0.02 * jax.random.normal(ks[0], (10, C), jnp.float32),
        "pseudo_emb": 0.02 * jax.random.normal(ks[1], (10, C), jnp.float32),
        "attr_emb":   0.02 * jax.random.normal(ks[2], (100, C), jnp.float32),
        "unit_emb":   0.02 * jax.random.normal(ks[3], (20, C), jnp.float32),
        # value_projection: Linear(1, C)
        "value_w": _xavier_uniform(ks[4], (C, 1)),            # (out, in)
        "value_b": 0.01 * jax.random.normal(ks[5], (C,), jnp.float32),
        # MultiheadAttention(embed_dim=C, num_heads=4): in_proj (3C,C), out_proj (C,C)
        "wqkv_t": _xavier_uniform(ks[6], (3 * C, C)).T,       # (C, 3C)
        "bqkv":   0.01 * jax.random.normal(ks[7], (1, 3 * C), jnp.float32),
        "wo_t":   _xavier_uniform(ks[8], (C, C)).T,           # (C, C)
        "bo":     0.01 * jax.random.normal(ks[9], (1, C), jnp.float32),
        # output_projection: Linear(C, E)
        "wout_t": _xavier_uniform(ks[10], (E, C)).T,          # (C, E)
        "bout":   0.01 * jax.random.normal(ks[11], (1, E), jnp.float32),
    }


# ---------------------------------------------------------------------------
# Glue: build the stacked component tensor (replaces dict parsing / hashing)
# ---------------------------------------------------------------------------
# TODO(synk): Python-side string hashing / dict parsing / value.isdigit() of
# component_dicts has no device equivalent; we take pre-hashed integer ids,
# parsed float values and presence masks instead.
# TODO(synk): the embedding-table row gather is left in XLA glue; fusing it
# into the kernel (tables in VMEM + ids via scalar prefetch) is a further
# optimization not applied here.
def build_component_stack(params, device_ids, pseudo_ids, attr_ids,
                          unit_ids, values, presence):
    d = params["device_emb"][device_ids]                          # (B, C)
    p = params["pseudo_emb"][pseudo_ids]
    a = params["attr_emb"][attr_ids]
    val = values[:, None] * params["value_w"][:, 0][None, :] + \
        params["value_b"][None, :]                                # (B, C)
    u = params["unit_emb"][unit_ids]
    stack = jnp.stack([d, p, a, val, u], axis=1)                  # (B, 5, C)
    # missing components contribute zeros (as in encode_component)
    return stack * presence[:, :, None]


# ---------------------------------------------------------------------------
# Pure-JAX reference of the hot path (straight, unfused f32 attention math)
# ---------------------------------------------------------------------------
def reference_forward(x_stack, wqkv_t, bqkv, wo_t, bo, wout_t, bout):
    B, S, C = x_stack.shape
    H, Dh = NUM_HEADS, C // NUM_HEADS
    qkv = jnp.einsum("bsc,cd->bsd", x_stack, wqkv_t) + bqkv[None]
    q, k, v = qkv[..., :C], qkv[..., C:2 * C], qkv[..., 2 * C:]
    qh = q.reshape(B, S, H, Dh)
    kh = k.reshape(B, S, H, Dh)
    vh = v.reshape(B, S, H, Dh)
    scores = jnp.einsum("bqhd,bkhd->bhqk", qh, kh) / math.sqrt(Dh)
    p = jax.nn.softmax(scores, axis=-1)
    attn = jnp.einsum("bhqk,bkhd->bqhd", p, vh).reshape(B, S, C)
    o = jnp.einsum("bsc,cd->bsd", attn, wo_t) + bo[None]
    composed = jnp.mean(o, axis=1)
    return composed @ wout_t + bout


if __name__ == "__main__":
    key = jax.random.PRNGKey(0)
    kparam, kdata = jax.random.split(key)
    params = init_params(kparam)

    B = 12  # number of component dicts in the batch (padded to 16, grid of 2)
    ks = jax.random.split(kdata, 6)
    device_ids = jax.random.randint(ks[0], (B,), 0, 10)
    pseudo_ids = jax.random.randint(ks[1], (B,), 0, 10)
    attr_ids = jax.random.randint(ks[2], (B,), 0, 100)
    unit_ids = jax.random.randint(ks[3], (B,), 0, 20)
    values = jax.random.uniform(ks[4], (B,), jnp.float32, 0.0, 10.0)
    presence = (jax.random.uniform(ks[5], (B, NUM_COMPONENTS)) > 0.2
                ).astype(jnp.float32)

    x_stack = build_component_stack(params, device_ids, pseudo_ids, attr_ids,
                                    unit_ids, values, presence)

    out = compositional_embedding_forward(
        x_stack, params["wqkv_t"], params["bqkv"], params["wo_t"],
        params["bo"], params["wout_t"], params["bout"], block_b=8)
    out = jax.block_until_ready(out)

    # The kernel consumes bf16 activations/weights, so compare against the
    # f32 reference evaluated on the bf16-quantized activations with
    # bf16-appropriate tolerances.
    x_q = x_stack.astype(jnp.bfloat16).astype(jnp.float32)
    ref = reference_forward(
        x_q, params["wqkv_t"], params["bqkv"], params["wo_t"],
        params["bo"], params["wout_t"], params["bout"])

    assert out.shape == (B, EMBEDDING_DIM), out.shape
    max_err = float(jnp.max(jnp.abs(out - ref)))
    assert jnp.allclose(out, ref, atol=1e-2, rtol=5e-2), max_err
    print("KERNEL_OK")
</pallas_src>

<mosaic_0001>
module attributes {stable_mosaic.version = 11 : i64} {
  func.func @_compose_kernel(%arg0: i32, %arg1: memref<5x8x128xbf16, #tpu.memory_space<vmem>>, %arg2: memref<128x384xbf16, #tpu.memory_space<vmem>>, %arg3: memref<1x384xf32, #tpu.memory_space<vmem>>, %arg4: memref<128x128xbf16, #tpu.memory_space<vmem>>, %arg5: memref<128x768xbf16, #tpu.memory_space<vmem>>, %arg6: memref<1x768xf32, #tpu.memory_space<vmem>>, %arg7: memref<8x768xf32, #tpu.memory_space<vmem>>) attributes {dimension_semantics = [#tpu.dimension_semantics<parallel>], iteration_bounds = array<i64: 2>, scalar_prefetch = 0 : i64, scratch_operands = 0 : i64, tpu.core_type = #tpu.core_type<tc>, window_params = [{transform_indices = @transform_0, window_bounds = array<i64: 5, 8, 128>}, {pipeline_mode = #tpu.pipeline_mode<synchronous>, transform_indices = @transform_1, window_bounds = array<i64: 128, 384>}, {pipeline_mode = #tpu.pipeline_mode<synchronous>, transform_indices = @transform_2, window_bounds = array<i64: 1, 384>}, {pipeline_mode = #tpu.pipeline_mode<synchronous>, transform_indices = @transform_3, window_bounds = array<i64: 128, 128>}, {pipeline_mode = #tpu.pipeline_mode<synchronous>, transform_indices = @transform_4, window_bounds = array<i64: 128, 768>}, {pipeline_mode = #tpu.pipeline_mode<synchronous>, transform_indices = @transform_5, window_bounds = array<i64: 1, 768>}, {transform_indices = @transform_6, window_bounds = array<i64: 8, 768>}]} {
    %c0 = arith.constant 0 : index
    %c0_0 = arith.constant 0 : index
    %0 = vector.load %arg2[%c0, %c0_0] : memref<128x384xbf16, #tpu.memory_space<vmem>>, vector<128x384xbf16>
    %c0_1 = arith.constant 0 : index
    %c0_2 = arith.constant 0 : index
    %1 = vector.load %arg3[%c0_1, %c0_2] : memref<1x384xf32, #tpu.memory_space<vmem>>, vector<1x384xf32>
    %c0_3 = arith.constant 0 : index
    %c0_4 = arith.constant 0 : index
    %2 = vector.load %arg4[%c0_3, %c0_4] : memref<128x128xbf16, #tpu.memory_space<vmem>>, vector<128x128xbf16>
    %c0_5 = arith.constant 0 : index
    %c0_6 = arith.constant 0 : index
    %c0_7 = arith.constant 0 : index
    %3 = vector.load %arg1[%c0_5, %c0_6, %c0_7] : memref<5x8x128xbf16, #tpu.memory_space<vmem>>, vector<1x8x128xbf16>
    %4 = vector.shape_cast %3 : vector<1x8x128xbf16> to vector<8x128xbf16>
    %cst = arith.constant dense<0.000000e+00> : vector<8x384xf32>
    %5 = tpu.matmul %4, %0, %cst {dimension_numbers = #tpu.dot_dimension_numbers<[1], [0], [0], [1], [0, 0, 1, 1], [], []>} : vector<8x128xbf16>, vector<128x384xbf16>, vector<8x384xf32> -> vector<8x384xf32>
    %6 = vector.broadcast %1 : vector<1x384xf32> to vector<8x384xf32>
    %7 = arith.addf %5, %6 : vector<8x384xf32>
    %8 = vector.extract_strided_slice %7 {offsets = [0, 0], sizes = [8, 128], strides = [1, 1]} : vector<8x384xf32> to vector<8x128xf32>
    %9 = vector.extract_strided_slice %7 {offsets = [0, 128], sizes = [8, 128], strides = [1, 1]} : vector<8x384xf32> to vector<8x128xf32>
    %10 = vector.extract_strided_slice %7 {offsets = [0, 256], sizes = [8, 128], strides = [1, 1]} : vector<8x384xf32> to vector<8x128xf32>
    %c1 = arith.constant 1 : index
    %c0_8 = arith.constant 0 : index
    %c0_9 = arith.constant 0 : index
    %11 = vector.load %arg1[%c1, %c0_8, %c0_9] : memref<5x8x128xbf16, #tpu.memory_space<vmem>>, vector<1x8x128xbf16>
    %12 = vector.shape_cast %11 : vector<1x8x128xbf16> to vector<8x128xbf16>
    %cst_10 = arith.constant dense<0.000000e+00> : vector<8x384xf32>
    %13 = tpu.matmul %12, %0, %cst_10 {dimension_numbers = #tpu.dot_dimension_numbers<[1], [0], [0], [1], [0, 0, 1, 1], [], []>} : vector<8x128xbf16>, vector<128x384xbf16>, vector<8x384xf32> -> vector<8x384xf32>
    %14 = vector.broadcast %1 : vector<1x384xf32> to vector<8x384xf32>
    %15 = arith.addf %13, %14 : vector<8x384xf32>
    %16 = vector.extract_strided_slice %15 {offsets = [0, 0], sizes = [8, 128], strides = [1, 1]} : vector<8x384xf32> to vector<8x128xf32>
    %17 = vector.extract_strided_slice %15 {offsets = [0, 128], sizes = [8, 128], strides = [1, 1]} : vector<8x384xf32> to vector<8x128xf32>
    %18 = vector.extract_strided_slice %15 {offsets = [0, 256], sizes = [8, 128], strides = [1, 1]} : vector<8x384xf32> to vector<8x128xf32>
    %c2 = arith.constant 2 : index
    %c0_11 = arith.constant 0 : index
    %c0_12 = arith.constant 0 : index
    %19 = vector.load %arg1[%c2, %c0_11, %c0_12] : memref<5x8x128xbf16, #tpu.memory_space<vmem>>, vector<1x8x128xbf16>
    %20 = vector.shape_cast %19 : vector<1x8x128xbf16> to vector<8x128xbf16>
    %cst_13 = arith.constant dense<0.000000e+00> : vector<8x384xf32>
    %21 = tpu.matmul %20, %0, %cst_13 {dimension_numbers = #tpu.dot_dimension_numbers<[1], [0], [0], [1], [0, 0, 1, 1], [], []>} : vector<8x128xbf16>, vector<128x384xbf16>, vector<8x384xf32> -> vector<8x384xf32>
    %22 = vector.broadcast %1 : vector<1x384xf32> to vector<8x384xf32>
    %23 = arith.addf %21, %22 : vector<8x384xf32>
    %24 = vector.extract_strided_slice %23 {offsets = [0, 0], sizes = [8, 128], strides = [1, 1]} : vector<8x384xf32> to vector<8x128xf32>
    %25 = vector.extract_strided_slice %23 {offsets = [0, 128], sizes = [8, 128], strides = [1, 1]} : vector<8x384xf32> to vector<8x128xf32>
    %26 = vector.extract_strided_slice %23 {offsets = [0, 256], sizes = [8, 128], strides = [1, 1]} : vector<8x384xf32> to vector<8x128xf32>
    %c3 = arith.constant 3 : index
    %c0_14 = arith.constant 0 : index
    %c0_15 = arith.constant 0 : index
    %27 = vector.load %arg1[%c3, %c0_14, %c0_15] : memref<5x8x128xbf16, #tpu.memory_space<vmem>>, vector<1x8x128xbf16>
    %28 = vector.shape_cast %27 : vector<1x8x128xbf16> to vector<8x128xbf16>
    %cst_16 = arith.constant dense<0.000000e+00> : vector<8x384xf32>
    %29 = tpu.matmul %28, %0, %cst_16 {dimension_numbers = #tpu.dot_dimension_numbers<[1], [0], [0], [1], [0, 0, 1, 1], [], []>} : vector<8x128xbf16>, vector<128x384xbf16>, vector<8x384xf32> -> vector<8x384xf32>
    %30 = vector.broadcast %1 : vector<1x384xf32> to vector<8x384xf32>
    %31 = arith.addf %29, %30 : vector<8x384xf32>
    %32 = vector.extract_strided_slice %31 {offsets = [0, 0], sizes = [8, 128], strides = [1, 1]} : vector<8x384xf32> to vector<8x128xf32>
    %33 = vector.extract_strided_slice %31 {offsets = [0, 128], sizes = [8, 128], strides = [1, 1]} : vector<8x384xf32> to vector<8x128xf32>
    %34 = vector.extract_strided_slice %31 {offsets = [0, 256], sizes = [8, 128], strides = [1, 1]} : vector<8x384xf32> to vector<8x128xf32>
    %c4 = arith.constant 4 : index
    %c0_17 = arith.constant 0 : index
    %c0_18 = arith.constant 0 : index
    %35 = vector.load %arg1[%c4, %c0_17, %c0_18] : memref<5x8x128xbf16, #tpu.memory_space<vmem>>, vector<1x8x128xbf16>
    %36 = vector.shape_cast %35 : vector<1x8x128xbf16> to vector<8x128xbf16>
    %cst_19 = arith.constant dense<0.000000e+00> : vector<8x384xf32>
    %37 = tpu.matmul %36, %0, %cst_19 {dimension_numbers = #tpu.dot_dimension_numbers<[1], [0], [0], [1], [0, 0, 1, 1], [], []>} : vector<8x128xbf16>, vector<128x384xbf16>, vector<8x384xf32> -> vector<8x384xf32>
    %38 = vector.broadcast %1 : vector<1x384xf32> to vector<8x384xf32>
    %39 = arith.addf %37, %38 : vector<8x384xf32>
    %40 = vector.extract_strided_slice %39 {offsets = [0, 0], sizes = [8, 128], strides = [1, 1]} : vector<8x384xf32> to vector<8x128xf32>
    %41 = vector.extract_strided_slice %39 {offsets = [0, 128], sizes = [8, 128], strides = [1, 1]} : vector<8x384xf32> to vector<8x128xf32>
    %42 = vector.extract_strided_slice %39 {offsets = [0, 256], sizes = [8, 128], strides = [1, 1]} : vector<8x384xf32> to vector<8x128xf32>
    %43 = arith.mulf %8, %9 : vector<8x128xf32>
    %44 = arith.truncf %43 : vector<8x128xf32> to vector<8x128xbf16>
    %cst_20 = arith.constant dense<0.000000e+00> : vector<8x128xf32>
    %45 = tpu.matmul %44, %2, %cst_20 {dimension_numbers = #tpu.dot_dimension_numbers<[1], [0], [0], [1], [0, 0, 1, 1], [], []>} : vector<8x128xbf16>, vector<128x128xbf16>, vector<8x128xf32> -> vector<8x128xf32>
    %46 = arith.mulf %8, %17 : vector<8x128xf32>
    %47 = arith.truncf %46 : vector<8x128xf32> to vector<8x128xbf16>
    %cst_21 = arith.constant dense<0.000000e+00> : vector<8x128xf32>
    %48 = tpu.matmul %47, %2, %cst_21 {dimension_numbers = #tpu.dot_dimension_numbers<[1], [0], [0], [1], [0, 0, 1, 1], [], []>} : vector<8x128xbf16>, vector<128x128xbf16>, vector<8x128xf32> -> vector<8x128xf32>
    %49 = arith.mulf %8, %25 : vector<8x128xf32>
    %50 = arith.truncf %49 : vector<8x128xf32> to vector<8x128xbf16>
    %cst_22 = arith.constant dense<0.000000e+00> : vector<8x128xf32>
    %51 = tpu.matmul %50, %2, %cst_22 {dimension_numbers = #tpu.dot_dimension_numbers<[1], [0], [0], [1], [0, 0, 1, 1], [], []>} : vector<8x128xbf16>, vector<128x128xbf16>, vector<8x128xf32> -> vector<8x128xf32>
    %52 = arith.mulf %8, %33 : vector<8x128xf32>
    %53 = arith.truncf %52 : vector<8x128xf32> to vector<8x128xbf16>
    %cst_23 = arith.constant dense<0.000000e+00> : vector<8x128xf32>
    %54 = tpu.matmul %53, %2, %cst_23 {dimension_numbers = #tpu.dot_dimension_numbers<[1], [0], [0], [1], [0, 0, 1, 1], [], []>} : vector<8x128xbf16>, vector<128x128xbf16>, vector<8x128xf32> -> vector<8x128xf32>
    %55 = arith.mulf %8, %41 : vector<8x128xf32>
    %56 = arith.truncf %55 : vector<8x128xf32> to vector<8x128xbf16>
    %cst_24 = arith.constant dense<0.000000e+00> : vector<8x128xf32>
    %57 = tpu.matmul %56, %2, %cst_24 {dimension_numbers = #tpu.dot_dimension_numbers<[1], [0], [0], [1], [0, 0, 1, 1], [], []>} : vector<8x128xbf16>, vector<128x128xbf16>, vector<8x128xf32> -> vector<8x128xf32>
    %58 = arith.maximumf %45, %48 : vector<8x128xf32>
    %59 = arith.maximumf %58, %51 : vector<8x128xf32>
    %60 = arith.maximumf %59, %54 : vector<8x128xf32>
    %61 = arith.maximumf %60, %57 : vector<8x128xf32>
    %62 = arith.subf %45, %61 : vector<8x128xf32>
    %63 = math.exp %62 : vector<8x128xf32>
    %64 = arith.subf %48, %61 : vector<8x128xf32>
    %65 = math.exp %64 : vector<8x128xf32>
    %66 = arith.subf %51, %61 : vector<8x128xf32>
    %67 = math.exp %66 : vector<8x128xf32>
    %68 = arith.subf %54, %61 : vector<8x128xf32>
    %69 = math.exp %68 : vector<8x128xf32>
    %70 = arith.subf %57, %61 : vector<8x128xf32>
    %71 = math.exp %70 : vector<8x128xf32>
    %72 = arith.addf %63, %65 : vector<8x128xf32>
    %73 = arith.addf %72, %67 : vector<8x128xf32>
    %74 = arith.addf %73, %69 : vector<8x128xf32>
    %75 = arith.addf %74, %71 : vector<8x128xf32>
    %76 = tpu.reciprocal %75 {approx = true} : vector<8x128xf32> -> vector<8x128xf32>
    %cst_25 = arith.constant 2.000000e-01 : f32
    %77 = vector.broadcast %cst_25 : f32 to vector<8x128xf32>
    %78 = arith.mulf %76, %77 : vector<8x128xf32>
    %79 = arith.mulf %63, %78 : vector<8x128xf32>
    %80 = arith.mulf %65, %78 : vector<8x128xf32>
    %81 = arith.mulf %67, %78 : vector<8x128xf32>
    %82 = arith.mulf %69, %78 : vector<8x128xf32>
    %83 = arith.mulf %71, %78 : vector<8x128xf32>
    %84 = arith.mulf %16, %9 : vector<8x128xf32>
    %85 = arith.truncf %84 : vector<8x128xf32> to vector<8x128xbf16>
    %cst_26 = arith.constant dense<0.000000e+00> : vector<8x128xf32>
    %86 = tpu.matmul %85, %2, %cst_26 {dimension_numbers = #tpu.dot_dimension_numbers<[1], [0], [0], [1], [0, 0, 1, 1], [], []>} : vector<8x128xbf16>, vector<128x128xbf16>, vector<8x128xf32> -> vector<8x128xf32>
    %87 = arith.mulf %16, %17 : vector<8x128xf32>
    %88 = arith.truncf %87 : vector<8x128xf32> to vector<8x128xbf16>
    %cst_27 = arith.constant dense<0.000000e+00> : vector<8x128xf32>
    %89 = tpu.matmul %88, %2, %cst_27 {dimension_numbers = #tpu.dot_dimension_numbers<[1], [0], [0], [1], [0, 0, 1, 1], [], []>} : vector<8x128xbf16>, vector<128x128xbf16>, vector<8x128xf32> -> vector<8x128xf32>
    %90 = arith.mulf %16, %25 : vector<8x128xf32>
    %91 = arith.truncf %90 : vector<8x128xf32> to vector<8x128xbf16>
    %cst_28 = arith.constant dense<0.000000e+00> : vector<8x128xf32>
    %92 = tpu.matmul %91, %2, %cst_28 {dimension_numbers = #tpu.dot_dimension_numbers<[1], [0], [0], [1], [0, 0, 1, 1], [], []>} : vector<8x128xbf16>, vector<128x128xbf16>, vector<8x128xf32> -> vector<8x128xf32>
    %93 = arith.mulf %16, %33 : vector<8x128xf32>
    %94 = arith.truncf %93 : vector<8x128xf32> to vector<8x128xbf16>
    %cst_29 = arith.constant dense<0.000000e+00> : vector<8x128xf32>
    %95 = tpu.matmul %94, %2, %cst_29 {dimension_numbers = #tpu.dot_dimension_numbers<[1], [0], [0], [1], [0, 0, 1, 1], [], []>} : vector<8x128xbf16>, vector<128x128xbf16>, vector<8x128xf32> -> vector<8x128xf32>
    %96 = arith.mulf %16, %41 : vector<8x128xf32>
    %97 = arith.truncf %96 : vector<8x128xf32> to vector<8x128xbf16>
    %cst_30 = arith.constant dense<0.000000e+00> : vector<8x128xf32>
    %98 = tpu.matmul %97, %2, %cst_30 {dimension_numbers = #tpu.dot_dimension_numbers<[1], [0], [0], [1], [0, 0, 1, 1], [], []>} : vector<8x128xbf16>, vector<128x128xbf16>, vector<8x128xf32> -> vector<8x128xf32>
    %99 = arith.maximumf %86, %89 : vector<8x128xf32>
    %100 = arith.maximumf %99, %92 : vector<8x128xf32>
    %101 = arith.maximumf %100, %95 : vector<8x128xf32>
    %102 = arith.maximumf %101, %98 : vector<8x128xf32>
    %103 = arith.subf %86, %102 : vector<8x128xf32>
    %104 = math.exp %103 : vector<8x128xf32>
    %105 = arith.subf %89, %102 : vector<8x128xf32>
    %106 = math.exp %105 : vector<8x128xf32>
    %107 = arith.subf %92, %102 : vector<8x128xf32>
    %108 = math.exp %107 : vector<8x128xf32>
    %109 = arith.subf %95, %102 : vector<8x128xf32>
    %110 = math.exp %109 : vector<8x128xf32>
    %111 = arith.subf %98, %102 : vector<8x128xf32>
    %112 = math.exp %111 : vector<8x128xf32>
    %113 = arith.addf %104, %106 : vector<8x128xf32>
    %114 = arith.addf %113, %108 : vector<8x128xf32>
    %115 = arith.addf %114, %110 : vector<8x128xf32>
    %116 = arith.addf %115, %112 : vector<8x128xf32>
    %117 = tpu.reciprocal %116 {approx = true} : vector<8x128xf32> -> vector<8x128xf32>
    %cst_31 = arith.constant 2.000000e-01 : f32
    %118 = vector.broadcast %cst_31 : f32 to vector<8x128xf32>
    %119 = arith.mulf %117, %118 : vector<8x128xf32>
    %120 = arith.mulf %104, %119 : vector<8x128xf32>
    %121 = arith.addf %79, %120 : vector<8x128xf32>
    %122 = arith.mulf %106, %119 : vector<8x128xf32>
    %123 = arith.addf %80, %122 : vector<8x128xf32>
    %124 = arith.mulf %108, %119 : vector<8x128xf32>
    %125 = arith.addf %81, %124 : vector<8x128xf32>
    %126 = arith.mulf %110, %119 : vector<8x128xf32>
    %127 = arith.addf %82, %126 : vector<8x128xf32>
    %128 = arith.mulf %112, %119 : vector<8x128xf32>
    %129 = arith.addf %83, %128 : vector<8x128xf32>
    %130 = arith.mulf %24, %9 : vector<8x128xf32>
    %131 = arith.truncf %130 : vector<8x128xf32> to vector<8x128xbf16>
    %cst_32 = arith.constant dense<0.000000e+00> : vector<8x128xf32>
    %132 = tpu.matmul %131, %2, %cst_32 {dimension_numbers = #tpu.dot_dimension_numbers<[1], [0], [0], [1], [0, 0, 1, 1], [], []>} : vector<8x128xbf16>, vector<128x128xbf16>, vector<8x128xf32> -> vector<8x128xf32>
    %133 = arith.mulf %24, %17 : vector<8x128xf32>
    %134 = arith.truncf %133 : vector<8x128xf32> to vector<8x128xbf16>
    %cst_33 = arith.constant dense<0.000000e+00> : vector<8x128xf32>
    %135 = tpu.matmul %134, %2, %cst_33 {dimension_numbers = #tpu.dot_dimension_numbers<[1], [0], [0], [1], [0, 0, 1, 1], [], []>} : vector<8x128xbf16>, vector<128x128xbf16>, vector<8x128xf32> -> vector<8x128xf32>
    %136 = arith.mulf %24, %25 : vector<8x128xf32>
    %137 = arith.truncf %136 : vector<8x128xf32> to vector<8x128xbf16>
    %cst_34 = arith.constant dense<0.000000e+00> : vector<8x128xf32>
    %138 = tpu.matmul %137, %2, %cst_34 {dimension_numbers = #tpu.dot_dimension_numbers<[1], [0], [0], [1], [0, 0, 1, 1], [], []>} : vector<8x128xbf16>, vector<128x128xbf16>, vector<8x128xf32> -> vector<8x128xf32>
    %139 = arith.mulf %24, %33 : vector<8x128xf32>
    %140 = arith.truncf %139 : vector<8x128xf32> to vector<8x128xbf16>
    %cst_35 = arith.constant dense<0.000000e+00> : vector<8x128xf32>
    %141 = tpu.matmul %140, %2, %cst_35 {dimension_numbers = #tpu.dot_dimension_numbers<[1], [0], [0], [1], [0, 0, 1, 1], [], []>} : vector<8x128xbf16>, vector<128x128xbf16>, vector<8x128xf32> -> vector<8x128xf32>
    %142 = arith.mulf %24, %41 : vector<8x128xf32>
    %143 = arith.truncf %142 : vector<8x128xf32> to vector<8x128xbf16>
    %cst_36 = arith.constant dense<0.000000e+00> : vector<8x128xf32>
    %144 = tpu.matmul %143, %2, %cst_36 {dimension_numbers = #tpu.dot_dimension_numbers<[1], [0], [0], [1], [0, 0, 1, 1], [], []>} : vector<8x128xbf16>, vector<128x128xbf16>, vector<8x128xf32> -> vector<8x128xf32>
    %145 = arith.maximumf %132, %135 : vector<8x128xf32>
    %146 = arith.maximumf %145, %138 : vector<8x128xf32>
    %147 = arith.maximumf %146, %141 : vector<8x128xf32>
    %148 = arith.maximumf %147, %144 : vector<8x128xf32>
    %149 = arith.subf %132, %148 : vector<8x128xf32>
    %150 = math.exp %149 : vector<8x128xf32>
    %151 = arith.subf %135, %148 : vector<8x128xf32>
    %152 = math.exp %151 : vector<8x128xf32>
    %153 = arith.subf %138, %148 : vector<8x128xf32>
    %154 = math.exp %153 : vector<8x128xf32>
    %155 = arith.subf %141, %148 : vector<8x128xf32>
    %156 = math.exp %155 : vector<8x128xf32>
    %157 = arith.subf %144, %148 : vector<8x128xf32>
    %158 = math.exp %157 : vector<8x128xf32>
    %159 = arith.addf %150, %152 : vector<8x128xf32>
    %160 = arith.addf %159, %154 : vector<8x128xf32>
    %161 = arith.addf %160, %156 : vector<8x128xf32>
    %162 = arith.addf %161, %158 : vector<8x128xf32>
    %163 = tpu.reciprocal %162 {approx = true} : vector<8x128xf32> -> vector<8x128xf32>
    %cst_37 = arith.constant 2.000000e-01 : f32
    %164 = vector.broadcast %cst_37 : f32 to vector<8x128xf32>
    %165 = arith.mulf %163, %164 : vector<8x128xf32>
    %166 = arith.mulf %150, %165 : vector<8x128xf32>
    %167 = arith.addf %121, %166 : vector<8x128xf32>
    %168 = arith.mulf %152, %165 : vector<8x128xf32>
    %169 = arith.addf %123, %168 : vector<8x128xf32>
    %170 = arith.mulf %154, %165 : vector<8x128xf32>
    %171 = arith.addf %125, %170 : vector<8x128xf32>
    %172 = arith.mulf %156, %165 : vector<8x128xf32>
    %173 = arith.addf %127, %172 : vector<8x128xf32>
    %174 = arith.mulf %158, %165 : vector<8x128xf32>
    %175 = arith.addf %129, %174 : vector<8x128xf32>
    %176 = arith.mulf %32, %9 : vector<8x128xf32>
    %177 = arith.truncf %176 : vector<8x128xf32> to vector<8x128xbf16>
    %cst_38 = arith.constant dense<0.000000e+00> : vector<8x128xf32>
    %178 = tpu.matmul %177, %2, %cst_38 {dimension_numbers = #tpu.dot_dimension_numbers<[1], [0], [0], [1], [0, 0, 1, 1], [], []>} : vector<8x128xbf16>, vector<128x128xbf16>, vector<8x128xf32> -> vector<8x128xf32>
    %179 = arith.mulf %32, %17 : vector<8x128xf32>
    %180 = arith.truncf %179 : vector<8x128xf32> to vector<8x128xbf16>
    %cst_39 = arith.constant dense<0.000000e+00> : vector<8x128xf32>
    %181 = tpu.matmul %180, %2, %cst_39 {dimension_numbers = #tpu.dot_dimension_numbers<[1], [0], [0], [1], [0, 0, 1, 1], [], []>} : vector<8x128xbf16>, vector<128x128xbf16>, vector<8x128xf32> -> vector<8x128xf32>
    %182 = arith.mulf %32, %25 : vector<8x128xf32>
    %183 = arith.truncf %182 : vector<8x128xf32> to vector<8x128xbf16>
    %cst_40 = arith.constant dense<0.000000e+00> : vector<8x128xf32>
    %184 = tpu.matmul %183, %2, %cst_40 {dimension_numbers = #tpu.dot_dimension_numbers<[1], [0], [0], [1], [0, 0, 1, 1], [], []>} : vector<8x128xbf16>, vector<128x128xbf16>, vector<8x128xf32> -> vector<8x128xf32>
    %185 = arith.mulf %32, %33 : vector<8x128xf32>
    %186 = arith.truncf %185 : vector<8x128xf32> to vector<8x128xbf16>
    %cst_41 = arith.constant dense<0.000000e+00> : vector<8x128xf32>
    %187 = tpu.matmul %186, %2, %cst_41 {dimension_numbers = #tpu.dot_dimension_numbers<[1], [0], [0], [1], [0, 0, 1, 1], [], []>} : vector<8x128xbf16>, vector<128x128xbf16>, vector<8x128xf32> -> vector<8x128xf32>
    %188 = arith.mulf %32, %41 : vector<8x128xf32>
    %189 = arith.truncf %188 : vector<8x128xf32> to vector<8x128xbf16>
    %cst_42 = arith.constant dense<0.000000e+00> : vector<8x128xf32>
    %190 = tpu.matmul %189, %2, %cst_42 {dimension_numbers = #tpu.dot_dimension_numbers<[1], [0], [0], [1], [0, 0, 1, 1], [], []>} : vector<8x128xbf16>, vector<128x128xbf16>, vector<8x128xf32> -> vector<8x128xf32>
    %191 = arith.maximumf %178, %181 : vector<8x128xf32>
    %192 = arith.maximumf %191, %184 : vector<8x128xf32>
    %193 = arith.maximumf %192, %187 : vector<8x128xf32>
    %194 = arith.maximumf %193, %190 : vector<8x128xf32>
    %195 = arith.subf %178, %194 : vector<8x128xf32>
    %196 = math.exp %195 : vector<8x128xf32>
    %197 = arith.subf %181, %194 : vector<8x128xf32>
    %198 = math.exp %197 : vector<8x128xf32>
    %199 = arith.subf %184, %194 : vector<8x128xf32>
    %200 = math.exp %199 : vector<8x128xf32>
    %201 = arith.subf %187, %194 : vector<8x128xf32>
    %202 = math.exp %201 : vector<8x128xf32>
    %203 = arith.subf %190, %194 : vector<8x128xf32>
    %204 = math.exp %203 : vector<8x128xf32>
    %205 = arith.addf %196, %198 : vector<8x128xf32>
    %206 = arith.addf %205, %200 : vector<8x128xf32>
    %207 = arith.addf %206, %202 : vector<8x128xf32>
    %208 = arith.addf %207, %204 : vector<8x128xf32>
    %209 = tpu.reciprocal %208 {approx = true} : vector<8x128xf32> -> vector<8x128xf32>
    %cst_43 = arith.constant 2.000000e-01 : f32
    %210 = vector.broadcast %cst_43 : f32 to vector<8x128xf32>
    %211 = arith.mulf %209, %210 : vector<8x128xf32>
    %212 = arith.mulf %196, %211 : vector<8x128xf32>
    %213 = arith.addf %167, %212 : vector<8x128xf32>
    %214 = arith.mulf %198, %211 : vector<8x128xf32>
    %215 = arith.addf %169, %214 : vector<8x128xf32>
    %216 = arith.mulf %200, %211 : vector<8x128xf32>
    %217 = arith.addf %171, %216 : vector<8x128xf32>
    %218 = arith.mulf %202, %211 : vector<8x128xf32>
    %219 = arith.addf %173, %218 : vector<8x128xf32>
    %220 = arith.mulf %204, %211 : vector<8x128xf32>
    %221 = arith.addf %175, %220 : vector<8x128xf32>
    %222 = arith.mulf %40, %9 : vector<8x128xf32>
    %223 = arith.truncf %222 : vector<8x128xf32> to vector<8x128xbf16>
    %cst_44 = arith.constant dense<0.000000e+00> : vector<8x128xf32>
    %224 = tpu.matmul %223, %2, %cst_44 {dimension_numbers = #tpu.dot_dimension_numbers<[1], [0], [0], [1], [0, 0, 1, 1], [], []>} : vector<8x128xbf16>, vector<128x128xbf16>, vector<8x128xf32> -> vector<8x128xf32>
    %225 = arith.mulf %40, %17 : vector<8x128xf32>
    %226 = arith.truncf %225 : vector<8x128xf32> to vector<8x128xbf16>
    %cst_45 = arith.constant dense<0.000000e+00> : vector<8x128xf32>
    %227 = tpu.matmul %226, %2, %cst_45 {dimension_numbers = #tpu.dot_dimension_numbers<[1], [0], [0], [1], [0, 0, 1, 1], [], []>} : vector<8x128xbf16>, vector<128x128xbf16>, vector<8x128xf32> -> vector<8x128xf32>
    %228 = arith.mulf %40, %25 : vector<8x128xf32>
    %229 = arith.truncf %228 : vector<8x128xf32> to vector<8x128xbf16>
    %cst_46 = arith.constant dense<0.000000e+00> : vector<8x128xf32>
    %230 = tpu.matmul %229, %2, %cst_46 {dimension_numbers = #tpu.dot_dimension_numbers<[1], [0], [0], [1], [0, 0, 1, 1], [], []>} : vector<8x128xbf16>, vector<128x128xbf16>, vector<8x128xf32> -> vector<8x128xf32>
    %231 = arith.mulf %40, %33 : vector<8x128xf32>
    %232 = arith.truncf %231 : vector<8x128xf32> to vector<8x128xbf16>
    %cst_47 = arith.constant dense<0.000000e+00> : vector<8x128xf32>
    %233 = tpu.matmul %232, %2, %cst_47 {dimension_numbers = #tpu.dot_dimension_numbers<[1], [0], [0], [1], [0, 0, 1, 1], [], []>} : vector<8x128xbf16>, vector<128x128xbf16>, vector<8x128xf32> -> vector<8x128xf32>
    %234 = arith.mulf %40, %41 : vector<8x128xf32>
    %235 = arith.truncf %234 : vector<8x128xf32> to vector<8x128xbf16>
    %cst_48 = arith.constant dense<0.000000e+00> : vector<8x128xf32>
    %236 = tpu.matmul %235, %2, %cst_48 {dimension_numbers = #tpu.dot_dimension_numbers<[1], [0], [0], [1], [0, 0, 1, 1], [], []>} : vector<8x128xbf16>, vector<128x128xbf16>, vector<8x128xf32> -> vector<8x128xf32>
    %237 = arith.maximumf %224, %227 : vector<8x128xf32>
    %238 = arith.maximumf %237, %230 : vector<8x128xf32>
    %239 = arith.maximumf %238, %233 : vector<8x128xf32>
    %240 = arith.maximumf %239, %236 : vector<8x128xf32>
    %241 = arith.subf %224, %240 : vector<8x128xf32>
    %242 = math.exp %241 : vector<8x128xf32>
    %243 = arith.subf %227, %240 : vector<8x128xf32>
    %244 = math.exp %243 : vector<8x128xf32>
    %245 = arith.subf %230, %240 : vector<8x128xf32>
    %246 = math.exp %245 : vector<8x128xf32>
    %247 = arith.subf %233, %240 : vector<8x128xf32>
    %248 = math.exp %247 : vector<8x128xf32>
    %249 = arith.subf %236, %240 : vector<8x128xf32>
    %250 = math.exp %249 : vector<8x128xf32>
    %251 = arith.addf %242, %244 : vector<8x128xf32>
    %252 = arith.addf %251, %246 : vector<8x128xf32>
    %253 = arith.addf %252, %248 : vector<8x128xf32>
    %254 = arith.addf %253, %250 : vector<8x128xf32>
    %255 = tpu.reciprocal %254 {approx = true} : vector<8x128xf32> -> vector<8x128xf32>
    %cst_49 = arith.constant 2.000000e-01 : f32
    %256 = vector.broadcast %cst_49 : f32 to vector<8x128xf32>
    %257 = arith.mulf %255, %256 : vector<8x128xf32>
    %258 = arith.mulf %242, %257 : vector<8x128xf32>
    %259 = arith.addf %213, %258 : vector<8x128xf32>
    %260 = arith.mulf %244, %257 : vector<8x128xf32>
    %261 = arith.addf %215, %260 : vector<8x128xf32>
    %262 = arith.mulf %246, %257 : vector<8x128xf32>
    %263 = arith.addf %217, %262 : vector<8x128xf32>
    %264 = arith.mulf %248, %257 : vector<8x128xf32>
    %265 = arith.addf %219, %264 : vector<8x128xf32>
    %266 = arith.mulf %250, %257 : vector<8x128xf32>
    %267 = arith.addf %221, %266 : vector<8x128xf32>
    %268 = arith.mulf %259, %10 : vector<8x128xf32>
    %269 = arith.mulf %261, %18 : vector<8x128xf32>
    %270 = arith.addf %268, %269 : vector<8x128xf32>
    %271 = arith.mulf %263, %26 : vector<8x128xf32>
    %272 = arith.addf %270, %271 : vector<8x128xf32>
    %273 = arith.mulf %265, %34 : vector<8x128xf32>
    %274 = arith.addf %272, %273 : vector<8x128xf32>
    %275 = arith.mulf %267, %42 : vector<8x128xf32>
    %276 = arith.addf %274, %275 : vector<8x128xf32>
    %277 = arith.truncf %276 : vector<8x128xf32> to vector<8x128xbf16>
    %c0_50 = arith.constant 0 : index
    %c0_51 = arith.constant 0 : index
    %278 = vector.load %arg5[%c0_50, %c0_51] : memref<128x768xbf16, #tpu.memory_space<vmem>>, vector<128x768xbf16>
    %cst_52 = arith.constant dense<0.000000e+00> : vector<8x768xf32>
    %279 = tpu.matmul %277, %278, %cst_52 {dimension_numbers = #tpu.dot_dimension_numbers<[1], [0], [0], [1], [0, 0, 1, 1], [], []>} : vector<8x128xbf16>, vector<128x768xbf16>, vector<8x768xf32> -> vector<8x768xf32>
    %c0_53 = arith.constant 0 : index
    %c0_54 = arith.constant 0 : index
    %280 = vector.load %arg6[%c0_53, %c0_54] : memref<1x768xf32, #tpu.memory_space<vmem>>, vector<1x768xf32>
    %281 = vector.broadcast %280 : vector<1x768xf32> to vector<8x768xf32>
    %282 = arith.addf %279, %281 : vector<8x768xf32>
    %c0_55 = arith.constant 0 : index
    %c0_56 = arith.constant 0 : index
    %283 = vector.load %arg7[%c0_55, %c0_56] : memref<8x768xf32, #tpu.memory_space<vmem>>, vector<8x768xf32>
    tpu.vector_store %arg7[%c0_55, %c0_56], %282 {strides = array<i32>} : memref<8x768xf32, #tpu.memory_space<vmem>>, vector<8x768xf32>,
    return
  }
  func.func @transform_0(%arg0: i32) -> (i32, i32, i32) {
    %c0_i32 = arith.constant 0 : i32
    %c0_i32_0 = arith.constant 0 : i32
    %c0_i32_1 = arith.constant 0 : i32
    return %c0_i32, %arg0, %c0_i32_0 : i32, i32, i32
  }
  func.func @transform_1(%arg0: i32) -> (i32, i32) {
    %c0_i32 = arith.constant 0 : i32
    %c0_i32_0 = arith.constant 0 : i32
    %c0_i32_1 = arith.constant 0 : i32
    return %c0_i32, %c0_i32_0 : i32, i32
  }
  func.func @transform_2(%arg0: i32) -> (i32, i32) {
    %c0_i32 = arith.constant 0 : i32
    %c0_i32_0 = arith.constant 0 : i32
    %c0_i32_1 = arith.constant 0 : i32
    return %c0_i32, %c0_i32_0 : i32, i32
  }
  func.func @transform_3(%arg0: i32) -> (i32, i32) {
    %c0_i32 = arith.constant 0 : i32
    %c0_i32_0 = arith.constant 0 : i32
    %c0_i32_1 = arith.constant 0 : i32
    return %c0_i32, %c0_i32_0 : i32, i32
  }
  func.func @transform_4(%arg0: i32) -> (i32, i32) {
    %c0_i32 = arith.constant 0 : i32
    %c0_i32_0 = arith.constant 0 : i32
    %c0_i32_1 = arith.constant 0 : i32
    return %c0_i32, %c0_i32_0 : i32, i32
  }
  func.func @transform_5(%arg0: i32) -> (i32, i32) {
    %c0_i32 = arith.constant 0 : i32
    %c0_i32_0 = arith.constant 0 : i32
    %c0_i32_1 = arith.constant 0 : i32
    return %c0_i32, %c0_i32_0 : i32, i32
  }
  func.func @transform_6(%arg0: i32) -> (i32, i32) {
    %c0_i32 = arith.constant 0 : i32
    %c0_i32_0 = arith.constant 0 : i32
    return %arg0, %c0_i32 : i32, i32
  }
}

</mosaic_0001>

<bundles_post_ra>
// kernel: tpu_custom_call.1
= control target key start
LH: loop header
LB: loop body
LE: loop exit
PB: predicated region body
PF: predicated region fallthrough
CT: control target
= control target key end

     0   :  { %s3522_s0 = inlined_call_operand.hbm [shape: bf16[5,16,128], index: 0, kind: input, shape index: {}]   ;;  %s3523_s1 = inlined_call_operand.hbm [shape: bf16[128,384], index: 1, kind: input, shape index: {}]   ;;  %s3524_s2 = inlined_call_operand.hbm [shape: f32[1,384], index: 2, kind: input, shape index: {}]   ;;  %s3525_s3 = inlined_call_operand.hbm [shape: bf16[128,128], index: 3, kind: input, shape index: {}]   ;;  %s3526_s4 = inlined_call_operand.hbm [shape: bf16[128,768], index: 4, kind: input, shape index: {}]   ;;  %s3527_s5 = inlined_call_operand.hbm [shape: f32[1,768], index: 5, kind: input, shape index: {}]   ;;  %s3528_s6 = inlined_call_operand.hbm [shape: f32[16,768], index: 6, kind: output, shape index: {}]  }
   0x1   :  { %3531 = sst [smem:[#allocation19_spill]] %s3523_s1 }
   0x2   :  { %3532 = sst [smem:[#allocation20_spill]] %s3524_s2 }
   0x3   :  { %11 = vsyncpa [#allocation3], 0 }
   0x4   :  { %13 = vsyncpa [#allocation3 + $0x1], 0 }
   0x5   :  { %14 = vsyncpa [#allocation6], 0 }
   0x6   :  { %15 = vsyncpa [#allocation9], 0 }
   0x7   :  { %16 = vsyncpa [#allocation12], 0 }
   0x8   :  { %17 = vsyncpa [#allocation4], 0 }
   0x9   :  { %19 = vsyncpa [#allocation4 + $0x1], 0  ;;  %s2759_s21 = smov 0   ;;  %s2761_s22 = smov 0  }
   0xa   :  { %s2763_s23 = smov 0   ;;  %s2765_s24 = smov 0  }
   0xb LB: > { %s2780_s25 = sadd.s32 4294967295, %s2710_s24   ;;  %s1862_s26 = sadd.s32 4294967294, %s2710_s24   ;;  %s2710_s24 = sphi %s2765_s24, %s3547_s24   ;;  %s2706_s23 = sphi %s2763_s23, %s3546_s23   ;;  %s2702_s22 = sphi %s2761_s22, %s3545_s22   ;;  %s2698_s21 = sphi %s2759_s21, %s3544_s21  }
   0xc   : > { %p45_p0 = scmp.ne.s32.totalorder %s2702_s22, %s2698_s21  ;;  %p46_p1 = scmp.eq.s32.totalorder %s2780_s25, 0 }
   0xd   : > { %p174_p2 = scmp.eq.s32.totalorder %s2780_s25, 1  ;;  %p180_p3 = scmp.eq.s32.totalorder %s1862_s26, 1 }
   0xe   : > { %p2789_p4 = por %p46_p1, %p45_p0  ;;  %p1863_p5 = scmp.ge.s32.totalorder %s2710_s24, 1 }
   0xf   : > { %p2794_p6 = por %p180_p3, %p45_p0  ;;  %p187_p7 = scmp.lt.s32.totalorder %s2710_s24, 3 }
  0x10   : > { %s3535_s1 = sld [smem:[#allocation19_spill]]  ;;  %s2712_s9 = smov [#allocation5]  }
  0x11   : > { %p2802_p8 = pnand %p1863_p5, %p187_p7  ;;  %s200_s10 = sshll.u32 %s2712_s9, 4  ;;  %s201_s10 = int_to_ptr.vmem [resolvable:$true] %s200_s10 }
  0x12   : > { %s224_s14 = sshll.u32 %s3525_s3, 4  ;;  %s2713_s15 = smov 192   ;;  %s225_s14 = int_to_ptr.hbm [resolvable:$true] %s224_s14 }
  0x13   : > { %p2312_p9 = pneg %p2802_p8  ;;  %s2714_s16 = smov 12  }
  0x14   : > { %s2715_s17 = smov [#allocation8]   ;;  %s3529_s19 = smov 64  }
  0x15   : > { %p2810_p10 = pnand %p2312_p9, %p46_p1  ;;  %s226_s18 = sshll.u32 %s2715_s17, 4  ;;  %s227_s18 = int_to_ptr.vmem [resolvable:$true] %s226_s18 }
  0x16   : > { %s198_s7 = sshll.u32 %s3535_s1, 4  ;;  %s3530_s20 = smov 4   ;;  %s199_s7 = int_to_ptr.hbm [resolvable:$true] %s198_s7 }
  0x17   : > { %2315 = dma.hbm_to_vmem [thread:$0]  (!%p2810_p10), %s199_s7, 3072, %s201_s10, [#allocation6], %s2713_s15, %s2713_s15, %s2714_s16  }
  0x18   : > { %2321 = dma.hbm_to_vmem [thread:$0]  (!%p2810_p10), %s225_s14, 1024, %s227_s18, [#allocation9], %s3529_s19, %s3529_s19, %s3530_s20  }
  0x19   : > { %s3538_s2 = sld [smem:[#allocation20_spill]]  ;;  %s2718_s9 = smov [#allocation7]  }
  0x1a   : > { %s215_s12 = sshll.u32 %s2718_s9, 4  ;;  %s238_s13 = sshll.u32 %s3526_s4, 4  ;;  %s216_s12 = int_to_ptr.vmem [resolvable:$true] %s215_s12  ;;  %s239_s13 = int_to_ptr.hbm [resolvable:$true] %s238_s13 }
  0x1b   : > { %s2719_s14 = smov [#allocation10]   ;;  %s2720_s16 = smov 384  }
  0x1c   : > { %s240_s15 = sshll.u32 %s2719_s14, 4  ;;  %s2721_s17 = smov 24   ;;  %s241_s15 = int_to_ptr.vmem [resolvable:$true] %s240_s15 }
  0x1d   : > { %2324 = dma.hbm_to_vmem [thread:$0]  (!%p2810_p10), %s239_s13, 6144, %s241_s15, [#allocation9], %s2720_s16, %s2720_s16, %s2721_s17  }
  0x1e   : > { %s253_s29 = sshll.u32 %s3527_s5, 4  ;;  %s32_s10 = sadd.s32 1, %s2706_s23  ;;  %s254_s29 = int_to_ptr.hbm [resolvable:$true] %s253_s29 }
  0x1f   : > { %s213_s30 = sshll.u32 %s3538_s2, 4  ;;  %p39_p13 = scmp.ne.s32.totalorder %s2706_s23, %s2702_s22  ;;  %s214_s30 = int_to_ptr.hbm [resolvable:$true] %s213_s30 }
  0x20   : > { %2318 = dma.hbm_to_vmem [thread:$0]  (!%p2810_p10), %s214_s30, 48, %s216_s12, [#allocation6]  }
  0x21   : > { %s2722_s30 = smov [#allocation11]   ;;  %s2841_s12 = sadd.s32 1, %s2710_s24  }
  0x22   : > { %s255_s9 = sshll.u32 %s2722_s30, 4  ;;  %s29_s7 = ssub.s32 %s2710_s24, %s2841_s12  ;;  %s256_s9 = int_to_ptr.vmem [resolvable:$true] %s255_s9 }
  0x23   : > { %2327 = dma.hbm_to_vmem [thread:$0]  (!%p2810_p10), %s254_s29, 96, %s256_s9, [#allocation12]  }
  0x24   : > { %p30_p12 = scmp.eq.s32.totalorder %s29_s7, 0  ;;  %p40_p0 = scmp.eq.s32.totalorder %s2710_s24, 0 }
  0x25   : > { %p2341_p3 = scmp.lt.s32.totalorder %s2710_s24, 2  ;;  %p2855_p7 = por %p174_p2, %p39_p13 }
  0x26   : > { %s2851_s13 = scalar_select %p30_p12, %s2706_s23, %s32_s10  }
  0x27   : > { %p41_p5 = por %p40_p0, %p39_p13  ;;  %s266_s15 = sand.u32 1, %s2706_s23  }
  0x28   : > { %s1870_s11 = sshll.u32 %s2710_s24, 2  ;;  %s2284_s16 = smul.u32 20, %s266_s15 }
  0x29   : > { %s274_s26 = scalar_lea.hbm %s3522_s0, %s1870_s11  ;;  %p2864_p9 = pnand %p2341_p3, %p41_p5 }
  0x2a   : > { %s275_s30 = sshll.u32 %s274_s26, 4  ;;  %s270_s9 = scalar_lea.vmem [#allocation2], %s2284_s16  ;;  %s276_s30 = int_to_ptr.hbm [resolvable:$true] %s275_s30 }
  0x2b   : > { %s277_s7 = sshll.u32 %s270_s9, 4  ;;  %s267_s10 = scalar_lea.sflag [#allocation3], %s266_s15  ;;  %s278_s7 = int_to_ptr.vmem [resolvable:$true] %s277_s7 }
  0x2c   : > { %s2602_s19 = sshra.s32 %s276_s30, 4  ;;  %p2606_p10 = pneg %p2864_p9  ;;  %s2603_s19 = int_to_ptr.hbm [resolvable:$true] %s2602_s19 }
  0x2d   : > { %s2604_s20 = scalar_lea.hbm %s2603_s19, 20  ;;  %s2609_s18 = scalar_lea.hbm %s3522_s0, 40 }
  0x2e   : > { %p2605_p2 = scmp.ne.s32.totalorder %s2603_s19, %s2604_s20  ;;  %p2610_p0 = scmp.lt.s32.totalorder %s2603_s19, %s3522_s0 }
  0x2f   : > { %p2611_p3 = scmp.lt.s32.totalorder %s2609_s18, %s2604_s20 }
  0x30   : > { %p2607_p12 = pnand %p2606_p10, %p2605_p2 }
  0x31   : > { %p2612_p5 = por %p2611_p3, %p2610_p0 }
  0x32   : > { %p2608_p13 = pneg %p2607_p12 }
  0x34   : > { %p2613_p11 = pnand %p2612_p5, %p2608_p13 }
  0x36   : > { %2616 = shalt.err (!%p2613_p11)
}
  0x37   : > { %s2723_s15 = smov 128   ;;  %s3541_s16 = smov 4  }
  0x38   : > { %s3542_s26 = smov 64   ;;  %289 = sbr.rel (%p2802_p8) target bundleno = 789 (0x315), region = 44 }
  0x39   : > { %2331 = dma.hbm_to_vmem [thread:$0]  (!%p2864_p9), %s276_s30, 320, %s278_s7, %s267_s10, %s2723_s15, %s3542_s26, %s3541_s16  }
  0x3a   : > { %s2883_s9 = sand.u32 (!%p2802_p8), 1, %s2702_s22  }
  0x3b   : > { %s2285_s1 = smul.u32 (!%p2802_p8), 20, %s2883_s9  ;;  %s292_s2 = scalar_lea.sflag (!%p2802_p8), [#allocation3], %s2883_s9 }
  0x3d   : > { %s2887_s19 = scalar_lea.vmem [#allocation2], %s2285_s1 }
  0x3e   : > { %2677 = dma.done.wait (%p2789_p4), %s292_s2, 320  }
  0x3f   : > { %2679 = vsyncadd (%p2789_p4), %s292_s2, 4294966976 }
  0x40   : > { %2681 = dma.done.wait (%p46_p1), [#allocation6], 3120  }
  0x41   : > { %2683 = vsyncadd (%p46_p1), [#allocation6], 4294964176 }
  0x42   : > { %2685 = dma.done.wait (%p46_p1), [#allocation9], 7168  }
  0x43   : > { %2687 = vsyncadd (%p46_p1), [#allocation9], 4294960128 }
  0x44   : > { %2689 = dma.done.wait (%p46_p1), [#allocation12], 96  }
  0x45   : > { %2691 = vsyncadd (%p46_p1), [#allocation12], 4294967200  ;;  %v1963_v0 = vld [vmem:[#allocation5 + $0xa8] sm:$0xf]  ;;  %v2226_v1 = vld [vmem:[#allocation5 + $0xb0] sm:$0xf0] }
  0x46   : > { %v2225_v2 = vld [vmem:[#allocation5 + $0xac] sm:$0xf]  ;;  %v2905_v3 = vor.u32 %v2226_v1, %v1963_v0  ;;  %v1965_v4 = vld [vmem:[#allocation5 + $0xb4] sm:$0xf0]  ;;  %v1971_v5 = vld [vmem:[#allocation5 + $0xb0] sm:$0xf] }
  0x47   : > { %v2227_v6 = vld [vmem:[#allocation5 + $0xb8] sm:$0xf0]  ;;  %v2907_v7 = vor.u32 %v2225_v2, %v1965_v4  ;;  %v1951_v9 = vld [vmem:[#allocation5 + $0x90] sm:$0xf]  ;;  %v2222_v11 = vld [vmem:[#allocation5 + $0x94] sm:$0xf] }
  0x48   : > { %v2909_v8 = vor.u32 %v2227_v6, %v1971_v5  ;;  %v2223_v10 = vld [vmem:[#allocation5 + $0x98] sm:$0xf0]  ;;  %535 = vmatpush.bf16.msra.mxu0 %v2905_v3  ;;  %576 = vmatpush.bf16.msra.mxu3 %v2905_v3  ;;  %v1953_v13 = vld [vmem:[#allocation5 + $0x9c] sm:$0xf0]  ;;  %v1959_v14 = vld [vmem:[#allocation5 + $0x98] sm:$0xf] }
  0x49   : > { %v2913_v12 = vor.u32 %v2223_v10, %v1951_v9  ;;  %v2224_v15 = vld [vmem:[#allocation5 + $0xa0] sm:$0xf0]  ;;  %548 = vmatpush.bf16.msra.mxu1 %v2907_v7  ;;  %v2917_v16 = vor.u32 %v2222_v11, %v1953_v13  ;;  %v1939_v18 = vld [vmem:[#allocation5 + $0x78] sm:$0xf]  ;;  %v2219_v20 = vld [vmem:[#allocation5 + $0x7c] sm:$0xf] }
  0x4a   : > { %561 = vmatpush.bf16.msra.mxu2 %v2909_v8  ;;  %v2919_v17 = vor.u32 %v2224_v15, %v1959_v14  ;;  %v2220_v19 = vld [vmem:[#allocation5 + $0x80] sm:$0xf0]  ;;  %v1941_v21 = vld [vmem:[#allocation5 + $0x84] sm:$0xf0]  ;;  %v1947_v22 = vld [vmem:[#allocation5 + $0x80] sm:$0xf] }
  0x4b   : > { %v2221_v23 = vld [vmem:[#allocation5 + $0x88] sm:$0xf0]  ;;  %v2923_v24 = vor.u32 %v2220_v19, %v1939_v18  ;;  %v2927_v25 = vor.u32 %v2219_v20, %v1941_v21  ;;  %v1927_v27 = vld [vmem:[#allocation5 + $0x60] sm:$0xf]  ;;  %v2216_v29 = vld [vmem:[#allocation5 + $0x64] sm:$0xf] }
  0x4c   : > { %536 = vmatpush.bf16.msra.mxu0 %v2913_v12  ;;  %577 = vmatpush.bf16.msra.mxu3 %v2913_v12  ;;  %v2929_v26 = vor.u32 %v2221_v23, %v1947_v22  ;;  %v2217_v28 = vld [vmem:[#allocation5 + $0x68] sm:$0xf0]  ;;  %v1929_v30 = vld [vmem:[#allocation5 + $0x6c] sm:$0xf0]  ;;  %v1935_v31 = vld [vmem:[#allocation5 + $0x68] sm:$0xf] }
  0x4d   : > { %549 = vmatpush.bf16.msra.mxu1 %v2917_v16  ;;  %v2218_v32 = vld [vmem:[#allocation5 + $0x70] sm:$0xf0]  ;;  %v2933_v33 = vor.u32 %v2217_v28, %v1927_v27  ;;  %v2937_v34 = vor.u32 %v2216_v29, %v1929_v30  ;;  %v1915_v36 = vld [vmem:[#allocation5 + $0x48] sm:$0xf]  ;;  %v2213_v38 = vld [vmem:[#allocation5 + $0x4c] sm:$0xf] }
  0x4e   : > { %562 = vmatpush.bf16.msra.mxu2 %v2919_v17  ;;  %v2939_v35 = vor.u32 %v2218_v32, %v1935_v31  ;;  %v2214_v37 = vld [vmem:[#allocation5 + $0x50] sm:$0xf0]  ;;  %v1917_v39 = vld [vmem:[#allocation5 + $0x54] sm:$0xf0]  ;;  %v1923_v40 = vld [vmem:[#allocation5 + $0x50] sm:$0xf] }
  0x4f   : > { %v2215_v41 = vld [vmem:[#allocation5 + $0x58] sm:$0xf0]  ;;  %v2943_v42 = vor.u32 %v2214_v37, %v1915_v36  ;;  %v2947_v43 = vor.u32 %v2213_v38, %v1917_v39  ;;  %v1903_v45 = vld [vmem:[#allocation5 + $0x30] sm:$0xf]  ;;  %v2210_v47 = vld [vmem:[#allocation5 + $0x34] sm:$0xf] }
  0x50   : > { %537 = vmatpush.bf16.msra.mxu0 %v2923_v24  ;;  %578 = vmatpush.bf16.msra.mxu3 %v2923_v24  ;;  %v2949_v44 = vor.u32 %v2215_v41, %v1923_v40  ;;  %v2211_v46 = vld [vmem:[#allocation5 + $0x38] sm:$0xf0]  ;;  %v1905_v48 = vld [vmem:[#allocation5 + $0x3c] sm:$0xf0]  ;;  %v1911_v49 = vld [vmem:[#allocation5 + $0x38] sm:$0xf] }
  0x51   : > { %550 = vmatpush.bf16.msra.mxu1 %v2927_v25  ;;  %v2212_v50 = vld [vmem:[#allocation5 + $0x40] sm:$0xf0]  ;;  %v2953_v51 = vor.u32 %v2211_v46, %v1903_v45  ;;  %v2957_v52 = vor.u32 %v2210_v47, %v1905_v48  ;;  %v1891_v54 = vld [vmem:[#allocation5 + $0x18] sm:$0xf]  ;;  %v2207_v56 = vld [vmem:[#allocation5 + $0x1c] sm:$0xf] }
  0x52   : > { %563 = vmatpush.bf16.msra.mxu2 %v2929_v26  ;;  %v2959_v53 = vor.u32 %v2212_v50, %v1911_v49  ;;  %v2208_v55 = vld [vmem:[#allocation5 + $0x20] sm:$0xf0]  ;;  %v1893_v57 = vld [vmem:[#allocation5 + $0x24] sm:$0xf0]  ;;  %v1899_v58 = vld [vmem:[#allocation5 + $0x20] sm:$0xf] }
  0x53   : > { %v2209_v59 = vld [vmem:[#allocation5 + $0x28] sm:$0xf0]  ;;  %v2963_v60 = vor.u32 %v2208_v55, %v1891_v54  ;;  %v2967_v61 = vor.u32 %v2207_v56, %v1893_v57  ;;  %v1879_v63 = vld [vmem:[#allocation5] sm:$0xf]  ;;  %v2204_v1 = vld [vmem:[#allocation5 + $0x4] sm:$0xf] }
  0x54   : > { %538 = vmatpush.bf16.msra.mxu0 %v2933_v33  ;;  %579 = vmatpush.bf16.msra.mxu3 %v2933_v33  ;;  %v2969_v62 = vor.u32 %v2209_v59, %v1899_v58  ;;  %v2205_v0 = vld [vmem:[#allocation5 + $0x8] sm:$0xf0]  ;;  %v1881_v2 = vld [vmem:[#allocation5 + $0xc] sm:$0xf0]  ;;  %v1887_v4 = vld [vmem:[#allocation5 + $0x8] sm:$0xf] }
  0x55   : > { %551 = vmatpush.bf16.msra.mxu1 %v2937_v34  ;;  %v2206_v5 = vld [vmem:[#allocation5 + $0x10] sm:$0xf0]  ;;  %v2973_v6 = vor.u32 %v2205_v0, %v1879_v63  ;;  %v2977_v9 = vor.u32 %v2204_v1, %v1881_v2  ;;  %v399_v11 = vld [vmem:[%s2887_s19] sm:$0xf]  ;;  %v1973_v13 = vld [vmem:[%s2887_s19 + $0x4] sm:$0xf] }
  0x56   : > { %564 = vmatpush.bf16.msra.mxu2 %v2939_v35  ;;  %v2979_v10 = vor.u32 %v2206_v5, %v1887_v4  ;;  %v1974_v14 = vld [vmem:[%s2887_s19 + $0x8] sm:$0xf]  ;;  %v1975_v15 = vld [vmem:[%s2887_s19 + $0xc] sm:$0xf]  ;;  %v1976_v19 = vld [vmem:[%s2887_s19 + $0x10] sm:$0xf] }
  0x57   : > { %v3055_v18 = vld [vmem:[#allocation8 + $0x38] sm:$0xff]  ;;  %v3100_v20 = vld [vmem:[#allocation8] sm:$0xff]  ;;  %s2286_s27 = smul.u32 48, %s2883_s9  ;;  %s2652_s26 = scalar_lea.hbm %s3528_s6, 96 }
  0x58   : > { %539 = vmatpush.bf16.msra.mxu0 %v2943_v42  ;;  %580 = vmatpush.bf16.msra.mxu3 %v2943_v42  ;;  %v382_v21 = vld [vmem:[#allocation7] sm:$0x7]  ;;  %s2287_s20 = smul.u32 48, %s2780_s25  ;;  %s1728_s25 = scalar_lea.sflag [#allocation4], %s2883_s9 }
  0x59   : > { %552 = vmatpush.bf16.msra.mxu1 %v2947_v43  ;;  %v3140_v22 = vperm.slane %v382_v21, 0  ;;  %v3143_v23 = vperm.slane %v382_v21, 1  ;;  %v3154_v28 = vperm.slane %v382_v21, 2  ;;  %s349_s8 = scalar_lea.vmem [#allocation13], %s2286_s27 }
  0x5a   : > { %565 = vmatpush.bf16.msra.mxu2 %v2949_v44  ;;  %s1739_s7 = scalar_lea.hbm %s3528_s6, %s2287_s20  ;;  %s1741_s10 = sshll.u32 %s349_s8, 4  ;;  %s1742_s10 = int_to_ptr.vmem [resolvable:$true] %s1741_s10 }
  0x5b   : > { %s1743_s11 = sshll.u32 %s1739_s7, 4  ;;  %s1744_s11 = int_to_ptr.hbm [resolvable:$true] %s1743_s11 }
  0x5c   : > { %540 = vmatpush.bf16.msra.mxu0 %v2953_v51  ;;  %581 = vmatpush.bf16.msra.mxu3 %v2953_v51  ;;  %s2646_s17 = sshra.s32 %s1744_s11, 4  ;;  %s2647_s17 = int_to_ptr.hbm [resolvable:$true] %s2646_s17 }
  0x5d   : > { %553 = vmatpush.bf16.msra.mxu1 %v2957_v52  ;;  %s2648_s18 = scalar_lea.hbm %s2647_s17, 48  ;;  %p2653_p11 = scmp.lt.s32.totalorder %s2647_s17, %s3528_s6 }
  0x5e   : > { %566 = vmatpush.bf16.msra.mxu2 %v2959_v53  ;;  %p2649_p1 = scmp.ne.s32.totalorder %s2647_s17, %s2648_s18  ;;  %p2654_p9 = scmp.lt.s32.totalorder %s2652_s26, %s2648_s18 }
  0x60   : > { %541 = vmatpush.bf16.msra.mxu0 %v2963_v60  ;;  %582 = vmatpush.bf16.msra.mxu3 %v2963_v60  ;;  %p2650_p4 = pnand %p2649_p1, %p2855_p7  ;;  %p2655_p2 = por %p2654_p9, %p2653_p11 }
  0x61   : > { %554 = vmatpush.bf16.msra.mxu1 %v2967_v61 }
  0x62   : > { %567 = vmatpush.bf16.msra.mxu2 %v2969_v62  ;;  %p2651_p8 = pneg %p2650_p4 }
  0x64   : > { %542 = vmatpush.bf16.msra.mxu0 %v2973_v6  ;;  %583 = vmatpush.bf16.msra.mxu3 %v2973_v6  ;;  %p2656_p10 = pnand %p2655_p2, %p2651_p8 }
  0x65   : > { %555 = vmatpush.bf16.msra.mxu1 %v2977_v9 }
  0x66   : > { %568 = vmatpush.bf16.msra.mxu2 %v2979_v10 }
  0x67   : > { %543 = vmatmul.bf16.vlgmr.msra.gmra.mxu0 %v399_v11  ;;  %584 = vmatmul.bf16.vlgmr.msra.gmra.mxu3 %v1973_v13 }
  0x68   : > { %589 = vmatpush.bf16.msrb.mxu0 %v2907_v7  ;;  %630 = vmatpush.bf16.msrb.mxu3 %v2907_v7 }
  0x69   : > { %602 = vmatpush.bf16.msrb.mxu1 %v2909_v8  ;;  %569 = vmatmul.bf16.vlgmr.msra.gmra.mxu2 %v399_v11 }
  0x6a   : > { %617 = vmatpush.bf16.msrb.mxu2 %v2905_v3  ;;  %556 = vmatmul.bf16.vlgmr.msra.gmra.mxu1 %v399_v11 }
  0x6c   : > { %590 = vmatpush.bf16.msrb.mxu0 %v2917_v16  ;;  %631 = vmatpush.bf16.msrb.mxu3 %v2917_v16 }
  0x6d   : > { %603 = vmatpush.bf16.msrb.mxu1 %v2919_v17 }
  0x6e   : > { %618 = vmatpush.bf16.msrb.mxu2 %v2913_v12 }
  0x70   : > { %591 = vmatpush.bf16.msrb.mxu0 %v2927_v25  ;;  %632 = vmatpush.bf16.msrb.mxu3 %v2927_v25 }
  0x71   : > { %604 = vmatpush.bf16.msrb.mxu1 %v2929_v26 }
  0x72   : > { %619 = vmatpush.bf16.msrb.mxu2 %v2923_v24 }
  0x74   : > { %592 = vmatpush.bf16.msrb.mxu0 %v2937_v34  ;;  %633 = vmatpush.bf16.msrb.mxu3 %v2937_v34 }
  0x75   : > { %605 = vmatpush.bf16.msrb.mxu1 %v2939_v35 }
  0x76   : > { %620 = vmatpush.bf16.msrb.mxu2 %v2933_v33 }
  0x78   : > { %593 = vmatpush.bf16.msrb.mxu0 %v2947_v43  ;;  %634 = vmatpush.bf16.msrb.mxu3 %v2947_v43 }
  0x79   : > { %606 = vmatpush.bf16.msrb.mxu1 %v2949_v44 }
  0x7a   : > { %621 = vmatpush.bf16.msrb.mxu2 %v2943_v42 }
  0x7c   : > { %594 = vmatpush.bf16.msrb.mxu0 %v2957_v52  ;;  %635 = vmatpush.bf16.msrb.mxu3 %v2957_v52 }
  0x7d   : > { %607 = vmatpush.bf16.msrb.mxu1 %v2959_v53 }
  0x7e   : > { %622 = vmatpush.bf16.msrb.mxu2 %v2953_v51 }
  0x80   : > { %595 = vmatpush.bf16.msrb.mxu0 %v2967_v61  ;;  %636 = vmatpush.bf16.msrb.mxu3 %v2967_v61 }
  0x81   : > { %608 = vmatpush.bf16.msrb.mxu1 %v2969_v62 }
  0x82   : > { %623 = vmatpush.bf16.msrb.mxu2 %v2963_v60 }
  0x84   : > { %596 = vmatpush.bf16.msrb.mxu0 %v2977_v9  ;;  %637 = vmatpush.bf16.msrb.mxu3 %v2977_v9 }
  0x85   : > { %609 = vmatpush.bf16.msrb.mxu1 %v2979_v10 }
  0x86   : > { %624 = vmatpush.bf16.msrb.mxu2 %v2973_v6 }
  0x87   : > { %597 = vmatmul.bf16.vlgmr.msrb.gmra.mxu0 %v1973_v13  ;;  %638 = vmatmul.bf16.vlgmr.msrb.gmra.mxu3 %v1974_v14 }
  0x88   : > { %643 = vmatpush.bf16.msra.mxu0 %v2909_v8  ;;  %610 = vmatmul.bf16.vlgmr.msrb.gmra.mxu1 %v1973_v13 }
  0x89   : > { %658 = vmatpush.bf16.msra.mxu1 %v2905_v3  ;;  %625 = vmatmul.bf16.vlgmr.msrb.gmra.mxu2 %v1974_v14 }
  0x8a   : > { %671 = vmatpush.bf16.msra.mxu2 %v2907_v7  ;;  %684 = vmatpush.bf16.msra.mxu3 %v2909_v8 }
  0x8c   : > { %644 = vmatpush.bf16.msra.mxu0 %v2919_v17 }
  0x8d   : > { %659 = vmatpush.bf16.msra.mxu1 %v2913_v12 }
  0x8e   : > { %672 = vmatpush.bf16.msra.mxu2 %v2917_v16  ;;  %685 = vmatpush.bf16.msra.mxu3 %v2919_v17 }
  0x90   : > { %645 = vmatpush.bf16.msra.mxu0 %v2929_v26 }
  0x91   : > { %660 = vmatpush.bf16.msra.mxu1 %v2923_v24 }
  0x92   : > { %673 = vmatpush.bf16.msra.mxu2 %v2927_v25  ;;  %686 = vmatpush.bf16.msra.mxu3 %v2929_v26 }
  0x94   : > { %646 = vmatpush.bf16.msra.mxu0 %v2939_v35 }
  0x95   : > { %661 = vmatpush.bf16.msra.mxu1 %v2933_v33 }
  0x96   : > { %674 = vmatpush.bf16.msra.mxu2 %v2937_v34  ;;  %687 = vmatpush.bf16.msra.mxu3 %v2939_v35 }
  0x98   : > { %647 = vmatpush.bf16.msra.mxu0 %v2949_v44 }
  0x99   : > { %662 = vmatpush.bf16.msra.mxu1 %v2943_v42 }
  0x9a   : > { %675 = vmatpush.bf16.msra.mxu2 %v2947_v43  ;;  %688 = vmatpush.bf16.msra.mxu3 %v2949_v44 }
  0x9c   : > { %648 = vmatpush.bf16.msra.mxu0 %v2959_v53 }
  0x9d   : > { %663 = vmatpush.bf16.msra.mxu1 %v2953_v51 }
  0x9e   : > { %676 = vmatpush.bf16.msra.mxu2 %v2957_v52  ;;  %689 = vmatpush.bf16.msra.mxu3 %v2959_v53 }
  0xa0   : > { %649 = vmatpush.bf16.msra.mxu0 %v2969_v62 }
  0xa1   : > { %664 = vmatpush.bf16.msra.mxu1 %v2963_v60 }
  0xa2   : > { %677 = vmatpush.bf16.msra.mxu2 %v2967_v61  ;;  %690 = vmatpush.bf16.msra.mxu3 %v2969_v62 }
  0xa4   : > { %650 = vmatpush.bf16.msra.mxu0 %v2979_v10 }
  0xa5   : > { %665 = vmatpush.bf16.msra.mxu1 %v2973_v6 }
  0xa6   : > { %678 = vmatpush.bf16.msra.mxu2 %v2977_v9  ;;  %691 = vmatpush.bf16.msra.mxu3 %v2979_v10 }
  0xa7   : > { %651 = vmatmul.bf16.vlgmr.msra.gmra.mxu0 %v1974_v14 }
  0xa8   : > { %699 = vmatpush.bf16.msrb.mxu0 %v2905_v3  ;;  %666 = vmatmul.bf16.vlgmr.msra.gmra.mxu1 %v1975_v15  ;;  %v3062_v3 = vld [vmem:[#allocation8 + $0x30] sm:$0xff] }
  0xa9   : > { %712 = vmatpush.bf16.msrb.mxu1 %v2907_v7  ;;  %679 = vmatmul.bf16.vlgmr.msra.gmra.mxu2 %v1975_v15  ;;  %v3068_v7 = vld [vmem:[#allocation8 + $0x28] sm:$0xff] }
  0xaa   : > { %725 = vmatpush.bf16.msrb.mxu2 %v2909_v8  ;;  %788 = vmatpush.bf16.msrb.mxu3 %v3055_v18  ;;  %v3074_v8 = vld [vmem:[#allocation8 + $0x20] sm:$0xff] }
  0xab   : > { %692 = vmatmul.bf16.vlgmr.msra.gmra.mxu3 %v1975_v15 }
  0xac   : > { %700 = vmatpush.bf16.msrb.mxu0 %v2913_v12  ;;  %v3080_v12 = vld [vmem:[#allocation8 + $0x18] sm:$0xff] }
  0xad   : > { %713 = vmatpush.bf16.msrb.mxu1 %v2917_v16  ;;  %v3086_v16 = vld [vmem:[#allocation8 + $0x10] sm:$0xff] }
  0xae   : > { %726 = vmatpush.bf16.msrb.mxu2 %v2919_v17  ;;  %789 = vmatpush.bf16.msrb.mxu3 %v3062_v3  ;;  %v3092_v17 = vld [vmem:[#allocation8 + $0x8] sm:$0xff] }
  0xb0   : > { %701 = vmatpush.bf16.msrb.mxu0 %v2923_v24 }
  0xb1   : > { %714 = vmatpush.bf16.msrb.mxu1 %v2927_v25 }
  0xb2   : > { %727 = vmatpush.bf16.msrb.mxu2 %v2929_v26  ;;  %790 = vmatpush.bf16.msrb.mxu3 %v3068_v7 }
  0xb4   : > { %702 = vmatpush.bf16.msrb.mxu0 %v2933_v33 }
  0xb5   : > { %715 = vmatpush.bf16.msrb.mxu1 %v2937_v34 }
  0xb6   : > { %728 = vmatpush.bf16.msrb.mxu2 %v2939_v35  ;;  %791 = vmatpush.bf16.msrb.mxu3 %v3074_v8 }
  0xb8   : > { %703 = vmatpush.bf16.msrb.mxu0 %v2943_v42 }
  0xb9   : > { %716 = vmatpush.bf16.msrb.mxu1 %v2947_v43 }
  0xba   : > { %729 = vmatpush.bf16.msrb.mxu2 %v2949_v44  ;;  %792 = vmatpush.bf16.msrb.mxu3 %v3080_v12 }
  0xbc   : > { %704 = vmatpush.bf16.msrb.mxu0 %v2953_v51 }
  0xbd   : > { %717 = vmatpush.bf16.msrb.mxu1 %v2957_v52 }
  0xbe   : > { %730 = vmatpush.bf16.msrb.mxu2 %v2959_v53  ;;  %793 = vmatpush.bf16.msrb.mxu3 %v3086_v16 }
  0xc0   : > { %705 = vmatpush.bf16.msrb.mxu0 %v2963_v60 }
  0xc1   : > { %718 = vmatpush.bf16.msrb.mxu1 %v2967_v61 }
  0xc2   : > { %731 = vmatpush.bf16.msrb.mxu2 %v2969_v62  ;;  %794 = vmatpush.bf16.msrb.mxu3 %v3092_v17 }
  0xc4   : > { %706 = vmatpush.bf16.msrb.mxu0 %v2973_v6 }
  0xc5   : > { %719 = vmatpush.bf16.msrb.mxu1 %v2977_v9 }
  0xc6   : > { %732 = vmatpush.bf16.msrb.mxu2 %v2979_v10  ;;  %795 = vmatpush.bf16.msrb.mxu3 %v3100_v20 }
  0xc7   : > { %707 = vmatmul.bf16.vlgmr.msrb.gmra.mxu0 %v1976_v19 }
  0xc8   : > { %803 = vmatpush.bf16.msra.mxu0 %v3055_v18  ;;  %720 = vmatmul.bf16.vlgmr.msrb.gmra.mxu1 %v1976_v19 }
  0xc9   : > { %818 = vmatpush.bf16.msra.mxu1 %v3055_v18  ;;  %733 = vmatmul.bf16.vlgmr.msrb.gmra.mxu2 %v1976_v19 }
  0xca   : > { %833 = vmatpush.bf16.msra.mxu2 %v3055_v18  ;;  %848 = vmatpush.bf16.msra.mxu3 %v3055_v18 }
  0xcc   : > { %804 = vmatpush.bf16.msra.mxu0 %v3062_v3 }
  0xcd   : > { %819 = vmatpush.bf16.msra.mxu1 %v3062_v3 }
  0xce   : > { %834 = vmatpush.bf16.msra.mxu2 %v3062_v3  ;;  %849 = vmatpush.bf16.msra.mxu3 %v3062_v3 }
  0xd0   : > { %805 = vmatpush.bf16.msra.mxu0 %v3068_v7 }
  0xd1   : > { %820 = vmatpush.bf16.msra.mxu1 %v3068_v7 }
  0xd2   : > { %835 = vmatpush.bf16.msra.mxu2 %v3068_v7  ;;  %850 = vmatpush.bf16.msra.mxu3 %v3068_v7 }
  0xd4   : > { %806 = vmatpush.bf16.msra.mxu0 %v3074_v8 }
  0xd5   : > { %821 = vmatpush.bf16.msra.mxu1 %v3074_v8 }
  0xd6   : > { %836 = vmatpush.bf16.msra.mxu2 %v3074_v8  ;;  %851 = vmatpush.bf16.msra.mxu3 %v3074_v8 }
  0xd8   : > { %807 = vmatpush.bf16.msra.mxu0 %v3080_v12 }
  0xd9   : > { %822 = vmatpush.bf16.msra.mxu1 %v3080_v12 }
  0xda   : > { %837 = vmatpush.bf16.msra.mxu2 %v3080_v12  ;;  %852 = vmatpush.bf16.msra.mxu3 %v3080_v12 }
  0xdc   : > { %808 = vmatpush.bf16.msra.mxu0 %v3086_v16 }
  0xdd   : > { %823 = vmatpush.bf16.msra.mxu1 %v3086_v16 }
  0xde   : > { %838 = vmatpush.bf16.msra.mxu2 %v3086_v16  ;;  %853 = vmatpush.bf16.msra.mxu3 %v3086_v16 }
  0xe0   : > { %809 = vmatpush.bf16.msra.mxu0 %v3092_v17 }
  0xe1   : > { %824 = vmatpush.bf16.msra.mxu1 %v3092_v17 }
  0xe2   : > { %839 = vmatpush.bf16.msra.mxu2 %v3092_v17  ;;  %854 = vmatpush.bf16.msra.mxu3 %v3092_v17 }
  0xe4   : > { %810 = vmatpush.bf16.msra.mxu0 %v3100_v20  ;;  %v544_v24 = vpop.f32.mrf.mxu0 }
  0xe5   : > { %825 = vmatpush.bf16.msra.mxu1 %v3100_v20  ;;  %v3148_v25 = vadd.f32 %v544_v24, %v3140_v22 }
  0xe6   : > { %840 = vmatpush.bf16.msra.mxu2 %v3100_v20  ;;  %855 = vmatpush.bf16.msra.mxu3 %v3100_v20 }
  0xe7   : > { %v557_v26 = vpop.f32.mrf.mxu1 }
  0xe8   : > { %893 = vmatpush.bf16.msrb.mxu0 %v3055_v18  ;;  %v3151_v27 = vadd.f32 %v557_v26, %v3143_v23 }
  0xe9   : > { %908 = vmatpush.bf16.msrb.mxu1 %v3055_v18 }
  0xea   : > { %923 = vmatpush.bf16.msrb.mxu2 %v3055_v18  ;;  %v738_v29 = vmul.f32 %v3151_v27, %v3148_v25  ;;  %v585_v33 = vpop.f32.mrf.mxu3 }
  0xeb   : > { %v3199_v51 = vadd.f32 %v585_v33, %v3140_v22 }
  0xec   : > { %894 = vmatpush.bf16.msrb.mxu0 %v3062_v3  ;;  %v570_v30 = vpop.f32.mrf.mxu2  ;;  %v739_v31 = vpack.c.bf16 %v738_v29, %v738_v29  ;;  %v546_v34 = vpop.f32.mrf.mxu0 }
  0xed   : > { %909 = vmatpush.bf16.msrb.mxu1 %v3062_v3  ;;  %v3162_v32 = vadd.f32 %v570_v30, %v3154_v28  ;;  %v891_v54 = vmul.f32 %v3199_v51, %v3151_v27 }
  0xee   : > { %924 = vmatpush.bf16.msrb.mxu2 %v3062_v3  ;;  %796 = vmatmul.bf16.vlgmr.msrb.gmra.mxu3 %v739_v31 }
  0xef   : > { %v559_v35 = vpop.f32.mrf.mxu1  ;;  %938 = vmatpush.bf16.msrb.mxu3 %v3055_v18  ;;  %v892_v55 = vpack.c.bf16 %v891_v54, %v891_v54 }
  0xf0   : > { %895 = vmatpush.bf16.msrb.mxu0 %v3068_v7 }
  0xf1   : > { %910 = vmatpush.bf16.msrb.mxu1 %v3068_v7 }
  0xf2   : > { %925 = vmatpush.bf16.msrb.mxu2 %v3068_v7  ;;  %v587_v37 = vpop.f32.mrf.mxu3 }
  0xf3   : > { %939 = vmatpush.bf16.msrb.mxu3 %v3062_v3 }
  0xf4   : > { %896 = vmatpush.bf16.msrb.mxu0 %v3074_v8  ;;  %v572_v36 = vpop.f32.mrf.mxu2 }
  0xf5   : > { %911 = vmatpush.bf16.msrb.mxu1 %v3074_v8 }
  0xf6   : > { %926 = vmatpush.bf16.msrb.mxu2 %v3074_v8 }
  0xf7   : > { %940 = vmatpush.bf16.msrb.mxu3 %v3068_v7 }
  0xf8   : > { %897 = vmatpush.bf16.msrb.mxu0 %v3080_v12 }
  0xf9   : > { %912 = vmatpush.bf16.msrb.mxu1 %v3080_v12 }
  0xfa   : > { %927 = vmatpush.bf16.msrb.mxu2 %v3080_v12 }
  0xfb   : > { %941 = vmatpush.bf16.msrb.mxu3 %v3074_v8 }
  0xfc   : > { %898 = vmatpush.bf16.msrb.mxu0 %v3086_v16 }
  0xfd   : > { %913 = vmatpush.bf16.msrb.mxu1 %v3086_v16 }
  0xfe   : > { %928 = vmatpush.bf16.msrb.mxu2 %v3086_v16 }
  0xff   : > { %942 = vmatpush.bf16.msrb.mxu3 %v3080_v12 }
 0x100   : > { %899 = vmatpush.bf16.msrb.mxu0 %v3092_v17 }
 0x101   : > { %914 = vmatpush.bf16.msrb.mxu1 %v3092_v17 }
 0x102   : > { %929 = vmatpush.bf16.msrb.mxu2 %v3092_v17 }
 0x103   : > { %943 = vmatpush.bf16.msrb.mxu3 %v3086_v16 }
 0x104   : > { %900 = vmatpush.bf16.msrb.mxu0 %v3100_v20  ;;  %v598_v38 = vpop.f32.mrf.mxu0 }
 0x105   : > { %915 = vmatpush.bf16.msrb.mxu1 %v3100_v20  ;;  %v3182_v39 = vadd.f32 %v598_v38, %v3143_v23  ;;  %v611_v40 = vpop.f32.mrf.mxu1 }
 0x106   : > { %930 = vmatpush.bf16.msrb.mxu2 %v3100_v20  ;;  %v3187_v42 = vadd.f32 %v611_v40, %v3154_v28 }
 0x107   : > { %v801_v41 = vmul.f32 %v3182_v39, %v3148_v25  ;;  %944 = vmatpush.bf16.msrb.mxu3 %v3092_v17  ;;  %v906_v56 = vmul.f32 %v3182_v39, %v3199_v51 }
 0x109   : > { %v802_v43 = vpack.c.bf16 %v801_v41, %v801_v41  ;;  %v907_v57 = vpack.c.bf16 %v906_v56, %v906_v56 }
 0x10a   : > { %v639_v45 = vpop.f32.mrf.mxu3 }
 0x10b   : > { %811 = vmatmul.bf16.vlgmr.msra.gmra.mxu0 %v802_v43  ;;  %v3191_v46 = vadd.f32 %v639_v45, %v3143_v23  ;;  %945 = vmatpush.bf16.msrb.mxu3 %v3100_v20 }
 0x10c   : > { %v626_v44 = vpop.f32.mrf.mxu2  ;;  %953 = vmatpush.bf16.msra.mxu0 %v3055_v18  ;;  %v600_v47 = vpop.f32.mrf.mxu0 }
 0x10d   : > { %v816_v48 = vmul.f32 %v3191_v46, %v3148_v25  ;;  %v613_v49 = vpop.f32.mrf.mxu1  ;;  %v3222_v61 = vadd.f32 %v626_v44, %v3140_v22  ;;  %v921_v10 = vmul.f32 %v3191_v46, %v3199_v51 }
 0x10f   : > { %v817_v50 = vpack.c.bf16 %v816_v48, %v816_v48  ;;  %v1001_v4 = vmul.f32 %v3222_v61, %v3151_v27  ;;  %v922_v11 = vpack.c.bf16 %v921_v10, %v921_v10  ;;  %v1016_v30 = vmul.f32 %v3222_v61, %v3182_v39 }
 0x110   : > { %954 = vmatpush.bf16.msra.mxu0 %v3062_v3  ;;  %v1031_v44 = vmul.f32 %v3191_v46, %v3222_v61 }
 0x111   : > { %826 = vmatmul.bf16.vlgmr.msra.gmra.mxu1 %v817_v50  ;;  %v1002_v6 = vpack.c.bf16 %v1001_v4, %v1001_v4  ;;  %v1017_v33 = vpack.c.bf16 %v1016_v30, %v1016_v30 }
 0x112   : > { %1003 = vmatpush.bf16.msra.mxu1 %v3055_v18  ;;  %v641_v53 = vpop.f32.mrf.mxu3  ;;  %v1032_v47 = vpack.c.bf16 %v1031_v44, %v1031_v44 }
 0x114   : > { %v628_v52 = vpop.f32.mrf.mxu2  ;;  %955 = vmatpush.bf16.msra.mxu0 %v3068_v7 }
 0x116   : > { %1004 = vmatpush.bf16.msra.mxu1 %v3062_v3 }
 0x118   : > { %956 = vmatpush.bf16.msra.mxu0 %v3074_v8 }
 0x11a   : > { %1005 = vmatpush.bf16.msra.mxu1 %v3068_v7 }
 0x11b   : > { %901 = vmatmul.bf16.vlgmr.msrb.gmra.mxu0 %v892_v55 }
 0x11c   : > { %957 = vmatpush.bf16.msra.mxu0 %v3080_v12 }
 0x11e   : > { %1006 = vmatpush.bf16.msra.mxu1 %v3074_v8 }
 0x120   : > { %958 = vmatpush.bf16.msra.mxu0 %v3086_v16 }
 0x121   : > { %916 = vmatmul.bf16.vlgmr.msrb.gmra.mxu1 %v907_v57 }
 0x122   : > { %1007 = vmatpush.bf16.msra.mxu1 %v3080_v12 }
 0x124   : > { %v652_v59 = vpop.f32.mrf.mxu0  ;;  %959 = vmatpush.bf16.msra.mxu0 %v3092_v17 }
 0x125   : > { %v3213_v58 = vpop.f32.mrf.mxu1  ;;  %v3217_v60 = vadd.f32 %v652_v59, %v3154_v28 }
 0x126   : > { %1008 = vmatpush.bf16.msra.mxu1 %v3086_v16  ;;  %v3304_v43 = vadd.f32 %v3213_v58, %v3140_v22 }
 0x128   : > { %960 = vmatpush.bf16.msra.mxu0 %v3100_v20  ;;  %v1141_v45 = vmul.f32 %v3304_v43, %v3191_v46  ;;  %v1111_v49 = vmul.f32 %v3304_v43, %v3151_v27  ;;  %v1126_v56 = vmul.f32 %v3304_v43, %v3182_v39 }
 0x12a   : > { %1009 = vmatpush.bf16.msra.mxu1 %v3092_v17  ;;  %v1142_v48 = vpack.c.bf16 %v1141_v45, %v1141_v45 }
 0x12c   : > { %v680_v62 = vpop.f32.mrf.mxu2  ;;  %1048 = vmatpush.bf16.msrb.mxu0 %v3055_v18  ;;  %v654_v1 = vpop.f32.mrf.mxu0 }
 0x12d   : > { %v3227_v63 = vadd.f32 %v680_v62, %v3143_v23  ;;  %v669_v0 = vpop.f32.mrf.mxu1 }
 0x12e   : > { %1010 = vmatpush.bf16.msra.mxu1 %v3100_v20  ;;  %v693_v38 = vpop.f32.mrf.mxu3 }
 0x12f   : > { %v831_v2 = vmul.f32 %v3227_v63, %v3148_v25  ;;  %v936_v34 = vmul.f32 %v3227_v63, %v3199_v51  ;;  %v1046_v35 = vmul.f32 %v3227_v63, %v3222_v61  ;;  %v3292_v40 = vadd.f32 %v693_v38, %v3154_v28 }
 0x130   : > { %1049 = vmatpush.bf16.msrb.mxu0 %v3062_v3  ;;  %v1156_v50 = vmul.f32 %v3227_v63, %v3304_v43 }
 0x131   : > { %v832_v5 = vpack.c.bf16 %v831_v2, %v831_v2  ;;  %1011 = vmatmul.bf16.vlgmr.msra.gmra.mxu1 %v1002_v6  ;;  %v937_v36 = vpack.c.bf16 %v936_v34, %v936_v34  ;;  %v1047_v37 = vpack.c.bf16 %v1046_v35, %v1046_v35 }
 0x132   : > { %1063 = vmatpush.bf16.msrb.mxu1 %v3055_v18  ;;  %v1157_v52 = vpack.c.bf16 %v1156_v50, %v1156_v50 }
 0x133   : > { %841 = vmatmul.bf16.vlgmr.msra.gmra.mxu2 %v832_v5 }
 0x134   : > { %1018 = vmatpush.bf16.msra.mxu2 %v3055_v18  ;;  %1050 = vmatpush.bf16.msrb.mxu0 %v3068_v7  ;;  %v682_v9 = vpop.f32.mrf.mxu2 }
 0x136   : > { %1064 = vmatpush.bf16.msrb.mxu1 %v3062_v3  ;;  %v695_v41 = vpop.f32.mrf.mxu3 }
 0x138   : > { %1019 = vmatpush.bf16.msra.mxu2 %v3062_v3  ;;  %1051 = vmatpush.bf16.msrb.mxu0 %v3074_v8 }
 0x13a   : > { %1065 = vmatpush.bf16.msrb.mxu1 %v3068_v7 }
 0x13c   : > { %1020 = vmatpush.bf16.msra.mxu2 %v3068_v7  ;;  %1052 = vmatpush.bf16.msrb.mxu0 %v3080_v12 }
 0x13e   : > { %1066 = vmatpush.bf16.msrb.mxu1 %v3074_v8 }
 0x140   : > { %1021 = vmatpush.bf16.msra.mxu2 %v3074_v8  ;;  %1053 = vmatpush.bf16.msrb.mxu0 %v3086_v16 }
 0x142   : > { %1067 = vmatpush.bf16.msrb.mxu1 %v3080_v12 }
 0x143   : > { %931 = vmatmul.bf16.vlgmr.msrb.gmra.mxu2 %v922_v11 }
 0x144   : > { %v3250_v13 = vpop.f32.mrf.mxu0  ;;  %1022 = vmatpush.bf16.msra.mxu2 %v3080_v12  ;;  %1054 = vmatpush.bf16.msrb.mxu0 %v3092_v17 }
 0x145   : > { %v721_v14 = vpop.f32.mrf.mxu1  ;;  %v3348_v55 = vadd.f32 %v3250_v13, %v3140_v22  ;;  %v1127_v22 = vpack.c.bf16 %v1126_v56, %v1126_v56 }
 0x146   : > { %v3254_v15 = vadd.f32 %v721_v14, %v3143_v23  ;;  %1068 = vmatpush.bf16.msrb.mxu1 %v3086_v16 }
 0x147   : > { %v1236_v57 = vmul.f32 %v3348_v55, %v3182_v39  ;;  %v1251_v62 = vmul.f32 %v3348_v55, %v3191_v46  ;;  %v1221_v9 = vmul.f32 %v3348_v55, %v3151_v27 }
 0x148   : > { %v846_v19 = vmul.f32 %v3254_v15, %v3148_v25  ;;  %v951_v21 = vmul.f32 %v3254_v15, %v3199_v51  ;;  %1023 = vmatpush.bf16.msra.mxu2 %v3086_v16  ;;  %1055 = vmatpush.bf16.msrb.mxu0 %v3100_v20  ;;  %v1061_v25 = vmul.f32 %v3254_v15, %v3222_v61 }
 0x149   : > { %v1112_v51 = vpack.c.bf16 %v1111_v49, %v1111_v49  ;;  %v1237_v58 = vpack.c.bf16 %v1236_v57, %v1236_v57  ;;  %v1171_v61 = vmul.f32 %v3254_v15, %v3304_v43  ;;  %v1252_v2 = vpack.c.bf16 %v1251_v62, %v1251_v62 }
 0x14a   : > { %v847_v24 = vpack.c.bf16 %v846_v19, %v846_v19  ;;  %v952_v26 = vpack.c.bf16 %v951_v21, %v951_v21  ;;  %1069 = vmatpush.bf16.msrb.mxu1 %v3092_v17  ;;  %v1062_v31 = vpack.c.bf16 %v1061_v25, %v1061_v25  ;;  %v1222_v11 = vpack.c.bf16 %v1221_v9, %v1221_v9 }
 0x14b   : > { %v1172_v0 = vpack.c.bf16 %v1171_v61, %v1171_v61  ;;  %v1266_v19 = vmul.f32 %v3348_v55, %v3227_v63 }
 0x14c   : > { %856 = vmatmul.bf16.vlgmr.msra.gmra.mxu3 %v847_v24  ;;  %961 = vmatmul.bf16.vlgmr.msra.gmra.mxu0 %v952_v26  ;;  %v710_v23 = vpop.f32.mrf.mxu0  ;;  %v734_v59 = vpop.f32.mrf.mxu2 }
 0x14d   : > { %1033 = vmatpush.bf16.msra.mxu3 %v3055_v18  ;;  %1143 = vmatpush.bf16.msra.mxu0 %v3055_v18  ;;  %v723_v29 = vpop.f32.mrf.mxu1  ;;  %v3368_v39 = vadd.f32 %v734_v59, %v3154_v28  ;;  %v1267_v27 = vpack.c.bf16 %v1266_v19, %v1266_v19 }
 0x14e   : > { %1024 = vmatpush.bf16.msra.mxu2 %v3092_v17  ;;  %1070 = vmatpush.bf16.msrb.mxu1 %v3100_v20 }
 0x151   : > { %1034 = vmatpush.bf16.msra.mxu3 %v3062_v3  ;;  %1144 = vmatpush.bf16.msra.mxu0 %v3062_v3 }
 0x152   : > { %1025 = vmatpush.bf16.msra.mxu2 %v3100_v20  ;;  %1158 = vmatpush.bf16.msra.mxu1 %v3055_v18 }
 0x153   : > { %1071 = vmatmul.bf16.vlgmr.msrb.gmra.mxu1 %v1062_v31 }
 0x154   : > { %v736_v28 = vpop.f32.mrf.mxu2 }
 0x155   : > { %1035 = vmatpush.bf16.msra.mxu3 %v3068_v7  ;;  %1145 = vmatpush.bf16.msra.mxu0 %v3068_v7 }
 0x156   : > { %1113 = vmatpush.bf16.msrb.mxu2 %v3055_v18  ;;  %1159 = vmatpush.bf16.msra.mxu1 %v3062_v3 }
 0x157   : > { %1026 = vmatmul.bf16.vlgmr.msra.gmra.mxu2 %v1017_v33 }
 0x159   : > { %1036 = vmatpush.bf16.msra.mxu3 %v3074_v8  ;;  %1146 = vmatpush.bf16.msra.mxu0 %v3074_v8 }
 0x15a   : > { %1114 = vmatpush.bf16.msrb.mxu2 %v3062_v3  ;;  %1160 = vmatpush.bf16.msra.mxu1 %v3068_v7 }
 0x15c   : > { %946 = vmatmul.bf16.vlgmr.msrb.gmra.mxu3 %v937_v36  ;;  %1056 = vmatmul.bf16.vlgmr.msrb.gmra.mxu0 %v1047_v37 }
 0x15d   : > { %1037 = vmatpush.bf16.msra.mxu3 %v3080_v12  ;;  %1147 = vmatpush.bf16.msra.mxu0 %v3080_v12 }
 0x15e   : > { %1115 = vmatpush.bf16.msrb.mxu2 %v3068_v7  ;;  %1161 = vmatpush.bf16.msra.mxu1 %v3074_v8 }
 0x161   : > { %1038 = vmatpush.bf16.msra.mxu3 %v3086_v16  ;;  %1148 = vmatpush.bf16.msra.mxu0 %v3086_v16 }
 0x162   : > { %1116 = vmatpush.bf16.msrb.mxu2 %v3074_v8  ;;  %1162 = vmatpush.bf16.msra.mxu1 %v3080_v12 }
 0x165   : > { %1039 = vmatpush.bf16.msra.mxu3 %v3092_v17  ;;  %1149 = vmatpush.bf16.msra.mxu0 %v3092_v17 }
 0x166   : > { %1117 = vmatpush.bf16.msrb.mxu2 %v3080_v12  ;;  %1163 = vmatpush.bf16.msra.mxu1 %v3086_v16 }
 0x169   : > { %1040 = vmatpush.bf16.msra.mxu3 %v3100_v20  ;;  %1150 = vmatpush.bf16.msra.mxu0 %v3100_v20 }
 0x16a   : > { %1118 = vmatpush.bf16.msrb.mxu2 %v3086_v16  ;;  %1164 = vmatpush.bf16.msra.mxu1 %v3092_v17 }
 0x16c   : > { %1041 = vmatmul.bf16.vlgmr.msra.gmra.mxu3 %v1032_v47  ;;  %1151 = vmatmul.bf16.vlgmr.msra.gmra.mxu0 %v1142_v48 }
 0x16d   : > { %1128 = vmatpush.bf16.msrb.mxu3 %v3055_v18  ;;  %1238 = vmatpush.bf16.msrb.mxu0 %v3055_v18 }
 0x16e   : > { %1119 = vmatpush.bf16.msrb.mxu2 %v3092_v17  ;;  %1165 = vmatpush.bf16.msra.mxu1 %v3100_v20 }
 0x171   : > { %1129 = vmatpush.bf16.msrb.mxu3 %v3062_v3  ;;  %1239 = vmatpush.bf16.msrb.mxu0 %v3062_v3  ;;  %v3336_v53 = vpop.f32.mrf.mxu3 }
 0x172   : > { %1120 = vmatpush.bf16.msrb.mxu2 %v3100_v20  ;;  %1253 = vmatpush.bf16.msrb.mxu1 %v3055_v18 }
 0x173   : > { %1166 = vmatmul.bf16.vlgmr.msra.gmra.mxu1 %v1157_v52 }
 0x175   : > { %1121 = vmatmul.bf16.vlgmr.msrb.gmra.mxu2 %v1112_v51  ;;  %1130 = vmatpush.bf16.msrb.mxu3 %v3068_v7 }
 0x176   : > { %1173 = vmatpush.bf16.msra.mxu2 %v3055_v18  ;;  %1240 = vmatpush.bf16.msrb.mxu0 %v3068_v7 }
 0x177   : > { %1254 = vmatpush.bf16.msrb.mxu1 %v3062_v3 }
 0x179   : > { %1131 = vmatpush.bf16.msrb.mxu3 %v3074_v8  ;;  %v799_v54 = vpop.f32.mrf.mxu3 }
 0x17a   : > { %1174 = vmatpush.bf16.msra.mxu2 %v3062_v3  ;;  %1241 = vmatpush.bf16.msrb.mxu0 %v3074_v8 }
 0x17b   : > { %1255 = vmatpush.bf16.msrb.mxu1 %v3068_v7 }
 0x17d   : > { %1132 = vmatpush.bf16.msrb.mxu3 %v3080_v12 }
 0x17e   : > { %1175 = vmatpush.bf16.msra.mxu2 %v3068_v7  ;;  %1242 = vmatpush.bf16.msrb.mxu0 %v3080_v12 }
 0x17f   : > { %1256 = vmatpush.bf16.msrb.mxu1 %v3074_v8 }
 0x181   : > { %1133 = vmatpush.bf16.msrb.mxu3 %v3086_v16 }
 0x182   : > { %1176 = vmatpush.bf16.msra.mxu2 %v3074_v8  ;;  %1243 = vmatpush.bf16.msrb.mxu0 %v3086_v16 }
 0x183   : > { %1257 = vmatpush.bf16.msrb.mxu1 %v3080_v12 }
 0x185   : > { %1134 = vmatpush.bf16.msrb.mxu3 %v3092_v17 }
 0x186   : > { %1177 = vmatpush.bf16.msra.mxu2 %v3080_v12  ;;  %1244 = vmatpush.bf16.msrb.mxu0 %v3092_v17 }
 0x187   : > { %1258 = vmatpush.bf16.msrb.mxu1 %v3086_v16 }
 0x188   : > { %v3376_v1 = vpop.f32.mrf.mxu0 }
 0x189   : > { %1135 = vmatpush.bf16.msrb.mxu3 %v3100_v20  ;;  %v861_v21 = vmax.f32 %v3336_v53, %v3376_v1 }
 0x18a   : > { %1178 = vmatpush.bf16.msra.mxu2 %v3086_v16  ;;  %1245 = vmatpush.bf16.msrb.mxu0 %v3100_v20 }
 0x18b   : > { %1259 = vmatpush.bf16.msrb.mxu1 %v3092_v17 }
 0x18c   : > { %1136 = vmatmul.bf16.vlgmr.msrb.gmra.mxu3 %v1127_v22 }
 0x18d   : > { %1223 = vmatpush.bf16.msra.mxu3 %v3055_v18  ;;  %1246 = vmatmul.bf16.vlgmr.msrb.gmra.mxu0 %v1237_v58 }
 0x18e   : > { %1179 = vmatpush.bf16.msra.mxu2 %v3092_v17  ;;  %v827_v46 = vpop.f32.mrf.mxu1 }
 0x18f   : > { %1260 = vmatpush.bf16.msrb.mxu1 %v3100_v20  ;;  %v862_v26 = vmax.f32 %v861_v21, %v827_v46 }
 0x190   : > { %v814_v4 = vpop.f32.mrf.mxu0 }
 0x191   : > { %1224 = vmatpush.bf16.msra.mxu3 %v3062_v3 }
 0x192   : > { %1180 = vmatpush.bf16.msra.mxu2 %v3100_v20  ;;  %1261 = vmatmul.bf16.vlgmr.msrb.gmra.mxu1 %v1252_v2 }
 0x195   : > { %1181 = vmatmul.bf16.vlgmr.msra.gmra.mxu2 %v1172_v0  ;;  %1225 = vmatpush.bf16.msra.mxu3 %v3068_v7 }
 0x196   : > { %1268 = vmatpush.bf16.msrb.mxu2 %v3055_v18  ;;  %v829_v5 = vpop.f32.mrf.mxu1 }
 0x198   : > { %v3386_v6 = vpop.f32.mrf.mxu0 }
 0x199   : > { %1226 = vmatpush.bf16.msra.mxu3 %v3074_v8 }
 0x19a   : > { %1269 = vmatpush.bf16.msrb.mxu2 %v3062_v3 }
 0x19d   : > { %1227 = vmatpush.bf16.msra.mxu3 %v3080_v12 }
 0x19e   : > { %1270 = vmatpush.bf16.msrb.mxu2 %v3068_v7  ;;  %v3394_v10 = vpop.f32.mrf.mxu1 }
 0x19f   : > { %v966_v13 = vmax.f32 %v3386_v6, %v3394_v10 }
 0x1a0   : > { %v904_v14 = vpop.f32.mrf.mxu0 }
 0x1a1   : > { %1228 = vmatpush.bf16.msra.mxu3 %v3086_v16 }
 0x1a2   : > { %1271 = vmatpush.bf16.msrb.mxu2 %v3074_v8 }
 0x1a5   : > { %1229 = vmatpush.bf16.msra.mxu3 %v3092_v17 }
 0x1a6   : > { %1272 = vmatpush.bf16.msrb.mxu2 %v3080_v12 }
 0x1a9   : > { %1230 = vmatpush.bf16.msra.mxu3 %v3100_v20 }
 0x1aa   : > { %1273 = vmatpush.bf16.msrb.mxu2 %v3086_v16 }
 0x1ac   : > { %1231 = vmatmul.bf16.vlgmr.msra.gmra.mxu3 %v1222_v11 }
 0x1ad   : > { %1283 = vmatpush.bf16.msrb.mxu3 %v3055_v18  ;;  %v919_v18 = vpop.f32.mrf.mxu1 }
 0x1ae   : > { %1274 = vmatpush.bf16.msrb.mxu2 %v3092_v17 }
 0x1b1   : > { %1284 = vmatpush.bf16.msrb.mxu3 %v3062_v3 }
 0x1b2   : > { %1275 = vmatpush.bf16.msrb.mxu2 %v3100_v20 }
 0x1b5   : > { %1276 = vmatmul.bf16.vlgmr.msrb.gmra.mxu2 %v1267_v27  ;;  %1285 = vmatpush.bf16.msrb.mxu3 %v3068_v7  ;;  %v3408_v24 = vpop.f32.mrf.mxu1  ;;  %v1281_v7 = vmul.f32 %v3254_v15, %v3348_v55 }
 0x1b6   : > { %v842_v3 = vpop.f32.mrf.mxu2 }
 0x1b7   : > { %v863_v63 = vmax.f32 %v862_v26, %v842_v3  ;;  %v1282_v29 = vpack.c.bf16 %v1281_v7, %v1281_v7 }
 0x1b9   : > { %1286 = vmatpush.bf16.msrb.mxu3 %v3074_v8 }
 0x1bd   : > { %1287 = vmatpush.bf16.msrb.mxu3 %v3080_v12  ;;  %v1014_v23 = vpop.f32.mrf.mxu1 }
 0x1be   : > { %v844_v8 = vpop.f32.mrf.mxu2 }
 0x1c1   : > { %1288 = vmatpush.bf16.msrb.mxu3 %v3086_v16 }
 0x1c5   : > { %1289 = vmatpush.bf16.msrb.mxu3 %v3092_v17 }
 0x1c6   : > { %v932_v25 = vpop.f32.mrf.mxu2 }
 0x1c7   : > { %v967_v12 = vmax.f32 %v966_v13, %v932_v25 }
 0x1c9   : > { %1290 = vmatpush.bf16.msrb.mxu3 %v3100_v20  ;;  %v962_v30 = vpop.f32.mrf.mxu0 }
 0x1cc   : > { %1291 = vmatmul.bf16.vlgmr.msrb.gmra.mxu3 %v1282_v29 }
 0x1ce   : > { %v934_v34 = vpop.f32.mrf.mxu2 }
 0x1cf   : > { %v857_v31 = vpop.f32.mrf.mxu3 }
 0x1d0   : > { %v864_v33 = vmax.f32 %v863_v63, %v857_v31  ;;  %v3417_v38 = vpop.f32.mrf.mxu1 }
 0x1d1   : > { %v964_v16 = vpop.f32.mrf.mxu0 }
 0x1d2   : > { %v865_v35 = vsub.f32 %v3336_v53, %v864_v33  ;;  %v868_v17 = vsub.f32 %v3376_v1, %v864_v33  ;;  %v871_v36 = vsub.f32 %v827_v46, %v864_v33  ;;  %v874_v37 = vsub.f32 %v842_v3, %v864_v33 }
 0x1d3   : > { %v877_v15 = vsub.f32 %v857_v31, %v864_v33 }
 0x1d4   : > { %v866_v20 = vmul.f32 1.442695, %v865_v35  ;;  %v869_v41 = vmul.f32 1.442695, %v868_v17  ;;  %v872_v43 = vmul.f32 1.442695, %v871_v36 }
 0x1d5   : > { %v875_v44 = vmul.f32 1.442695, %v874_v37  ;;  %v878_v47 = vmul.f32 1.442695, %v877_v15 }
 0x1d6   : > { %2392 = vpow2.f32 %v866_v20 }
 0x1d7   : > { %2394 = vpow2.f32 %v869_v41  ;;  %v859_v45 = vpop.f32.mrf.mxu3 }
 0x1d8   : > { %2396 = vpow2.f32 %v872_v43  ;;  %v1074_v51 = vpop.f32.mrf.mxu1 }
 0x1d9   : > { %v3421_v49 = vpop.f32.mrf.mxu0  ;;  %2398 = vpow2.f32 %v875_v44 }
 0x1da   : > { %v3419_v48 = vpop.f32.mrf.mxu2  ;;  %2400 = vpow2.f32 %v878_v47 }
 0x1db   : > { %v1076_v50 = vmax.f32 %v3408_v24, %v3419_v48 }
 0x1dc   : > { %v2393_v52 = vpop.eup %2392 }
 0x1dd   : > { %v2395_v53 = vpop.eup %2394 }
 0x1de   : > { %v880_v54 = vadd.f32 %v2395_v53, %v2393_v52  ;;  %v2397_v55 = vpop.eup %2396 }
 0x1df   : > { %v947_v56 = vpop.f32.mrf.mxu3  ;;  %v2399_v58 = vpop.eup %2398 }
 0x1e0   : > { %v881_v57 = vadd.f32 %v2397_v55, %v880_v54  ;;  %v968_v22 = vmax.f32 %v967_v12, %v947_v56  ;;  %v2401_v1 = vpop.eup %2400 }
 0x1e1   : > { %v1059_v61 = vpop.f32.mrf.mxu0 }
 0x1e2   : > { %v1029_v59 = vpop.f32.mrf.mxu2  ;;  %v882_v62 = vadd.f32 %v2399_v58, %v881_v57  ;;  %v969_v0 = vmax.f32 %v968_v22, %v962_v30 }
 0x1e4   : > { %v883_v2 = vadd.f32 %v2401_v1, %v882_v62  ;;  %v970_v28 = vsub.f32 %v3386_v6, %v969_v0  ;;  %v973_v46 = vsub.f32 %v3394_v10, %v969_v0  ;;  %v976_v4 = vsub.f32 %v932_v25, %v969_v0 }
 0x1e5   : > { %v979_v5 = vsub.f32 %v947_v56, %v969_v0  ;;  %v982_v9 = vsub.f32 %v962_v30, %v969_v0 }
 0x1e6   : > { %2402 = vrcp.f32 %v883_v2  ;;  %v971_v11 = vmul.f32 1.442695, %v970_v28  ;;  %v974_v13 = vmul.f32 1.442695, %v973_v46  ;;  %v977_v14 = vmul.f32 1.442695, %v976_v4 }
 0x1e7   : > { %v949_v19 = vpop.f32.mrf.mxu3  ;;  %v980_v27 = vmul.f32 1.442695, %v979_v5  ;;  %v983_v18 = vmul.f32 1.442695, %v982_v9 }
 0x1e8   : > { %2404 = vpow2.f32 %v971_v11 }
 0x1e9   : > { %2406 = vpow2.f32 %v974_v13  ;;  %v3427_v21 = vpop.f32.mrf.mxu0 }
 0x1ea   : > { %2408 = vpow2.f32 %v977_v14 }
 0x1eb   : > { %2410 = vpow2.f32 %v980_v27 }
 0x1ec   : > { %v2403_v26 = vpop.eup %2402  ;;  %2412 = vpow2.f32 %v983_v18 }
 0x1ed   : > { %v885_v3 = vmul.f32 0.2, %v2403_v26 }
 0x1ee   : > { %v2405_v6 = vpop.eup %2404 }
 0x1ef   : > { %v2407_v10 = vpop.eup %2406  ;;  %v886_v63 = vmul.f32 %v2393_v52, %v885_v3  ;;  %v887_v23 = vmul.f32 %v2395_v53, %v885_v3  ;;  %v890_v7 = vmul.f32 %v2401_v1, %v885_v3  ;;  %v889_v8 = vmul.f32 %v2399_v58, %v885_v3  ;;  %v1042_v29 = vpop.f32.mrf.mxu3 }
 0x1f0   : > { %v985_v25 = vadd.f32 %v2407_v10, %v2405_v6  ;;  %v3429_v12 = vpop.f32.mrf.mxu1  ;;  %v888_v30 = vmul.f32 %v2397_v55, %v885_v3  ;;  %v1077_v31 = vmax.f32 %v1076_v50, %v1042_v29  ;;  %v2409_v33 = vpop.eup %2408 }
 0x1f1   : > { %v1154_v35 = vpop.f32.mrf.mxu0  ;;  %v2411_v17 = vpop.eup %2410 }
 0x1f2   : > { %v986_v34 = vadd.f32 %v2409_v33, %v985_v25  ;;  %v1078_v16 = vmax.f32 %v1077_v31, %v3421_v49  ;;  %v2413_v36 = vpop.eup %2412 }
 0x1f4   : > { %v987_v37 = vadd.f32 %v2411_v17, %v986_v34  ;;  %v1079_v15 = vmax.f32 %v1078_v16, %v3417_v38 }
 0x1f6   : > { %v988_v41 = vadd.f32 %v2413_v36, %v987_v37  ;;  %v1080_v43 = vsub.f32 %v3408_v24, %v1079_v15  ;;  %v1083_v44 = vsub.f32 %v3419_v48, %v1079_v15  ;;  %v1086_v45 = vsub.f32 %v1042_v29, %v1079_v15 }
 0x1f7   : > { %v1089_v47 = vsub.f32 %v3421_v49, %v1079_v15  ;;  %v1092_v50 = vsub.f32 %v3417_v38, %v1079_v15  ;;  %v1044_v51 = vpop.f32.mrf.mxu3 }
 0x1f8   : > { %v3433_v20 = vpop.f32.mrf.mxu2  ;;  %2414 = vrcp.f32 %v988_v41  ;;  %v1081_v52 = vmul.f32 1.442695, %v1080_v43  ;;  %v1084_v53 = vmul.f32 1.442695, %v1083_v44  ;;  %v1169_v54 = vpop.f32.mrf.mxu1  ;;  %v1087_v55 = vmul.f32 1.442695, %v1086_v45 }
 0x1f9   : > { %v1090_v56 = vmul.f32 1.442695, %v1089_v47  ;;  %v1093_v57 = vmul.f32 1.442695, %v1092_v50 }
 0x1fa   : > { %2416 = vpow2.f32 %v1081_v52 }
 0x1fb   : > { %2418 = vpow2.f32 %v1084_v53 }
 0x1fc   : > { %2420 = vpow2.f32 %v1087_v55 }
 0x1fd   : > { %2422 = vpow2.f32 %v1090_v56 }
 0x1fe   : > { %v2415_v24 = vpop.eup %2414  ;;  %2424 = vpow2.f32 %v1093_v57 }
 0x1ff   : > { %v990_v58 = vmul.f32 0.2, %v2415_v24 }
 0x200   : > { %v1124_v22 = vpop.f32.mrf.mxu2  ;;  %v2417_v48 = vpop.eup %2416 }
 0x201   : > { %v2419_v49 = vpop.eup %2418  ;;  %v991_v59 = vmul.f32 %v2405_v6, %v990_v58  ;;  %v993_v38 = vmul.f32 %v2407_v10, %v990_v58  ;;  %v997_v61 = vmul.f32 %v2411_v17, %v990_v58  ;;  %v995_v62 = vmul.f32 %v2409_v33, %v990_v58 }
 0x202   : > { %v1095_v0 = vadd.f32 %v2419_v49, %v2417_v48  ;;  %v999_v1 = vmul.f32 %v2413_v36, %v990_v58  ;;  %v2421_v2 = vpop.eup %2420 }
 0x203   : > { %v992_v28 = vadd.f32 %v991_v59, %v886_v63  ;;  %v994_v46 = vadd.f32 %v993_v38, %v887_v23  ;;  %v998_v4 = vadd.f32 %v997_v61, %v889_v8  ;;  %v996_v5 = vadd.f32 %v995_v62, %v888_v30  ;;  %v2423_v13 = vpop.eup %2422  ;;  %v2179_v61 = vld [vmem:[#allocation10 + $0x150] sm:$0xf]  ;;  %v2281_v62 = vld [vmem:[#allocation10 + $0x164] sm:$0xf0] }
 0x204   : > { %v1096_v9 = vadd.f32 %v2421_v2, %v1095_v0  ;;  %v1000_v11 = vadd.f32 %v999_v1, %v890_v7  ;;  %v2425_v14 = vpop.eup %2424  ;;  %v2278_v0 = vld [vmem:[#allocation10 + $0x154] sm:$0xf]  ;;  %v2180_v1 = vor.u32 %v2281_v62, %v2179_v61 }
 0x206   : > { %v1097_v19 = vadd.f32 %v2423_v13, %v1096_v9  ;;  %1643 = vmatpush.bf16.msra.mxu0 %v2180_v1  ;;  %v2272_v9 = vld [vmem:[#allocation10 + $0x124] sm:$0xf]  ;;  %v2251_v1 = vld [vmem:[#allocation10 + $0x74] sm:$0xf0] }
 0x208   : > { %v1098_v18 = vadd.f32 %v2425_v14, %v1097_v19 }
 0x20a   : > { %v3439_v27 = vpop.f32.mrf.mxu0  ;;  %2426 = vrcp.f32 %v1098_v18 }
 0x20f   : > { %v1137_v26 = vpop.f32.mrf.mxu3  ;;  %v3442_v6 = vpop.f32.mrf.mxu1 }
 0x210   : > { %v1186_v3 = vmax.f32 %v3433_v20, %v1137_v26  ;;  %v2427_v23 = vpop.eup %2426 }
 0x211   : > { %v1100_v8 = vmul.f32 0.2, %v2427_v23 }
 0x212   : > { %v1187_v10 = vmax.f32 %v1186_v3, %v3427_v21  ;;  %v1249_v63 = vpop.f32.mrf.mxu0 }
 0x213   : > { %v1101_v25 = vmul.f32 %v2417_v48, %v1100_v8  ;;  %v1103_v30 = vmul.f32 %v2419_v49, %v1100_v8  ;;  %v1105_v31 = vmul.f32 %v2421_v2, %v1100_v8  ;;  %v1107_v33 = vmul.f32 %v2423_v13, %v1100_v8  ;;  %v2181_v2 = vld [vmem:[#allocation10 + $0x168] sm:$0xf0] }
 0x214   : > { %v1188_v29 = vmax.f32 %v1187_v10, %v3429_v12  ;;  %v1109_v34 = vmul.f32 %v2425_v14, %v1100_v8  ;;  %v2157_v14 = vld [vmem:[#allocation10 + $0x138] sm:$0xf0]  ;;  %v2131_v8 = vld [vmem:[#allocation10 + $0xf0] sm:$0xf] }
 0x215   : > { %v3446_v17 = vadd.f32 %v1105_v31, %v996_v5  ;;  %v1102_v36 = vadd.f32 %v1101_v25, %v992_v28  ;;  %v1104_v37 = vadd.f32 %v1103_v30, %v994_v46  ;;  %v1108_v41 = vadd.f32 %v1107_v33, %v998_v4  ;;  %v2155_v4 = vld [vmem:[#allocation10 + $0x120] sm:$0xf]  ;;  %v2275_v5 = vld [vmem:[#allocation10 + $0x134] sm:$0xf0]  ;;  %v2133_v31 = vld [vmem:[#allocation10 + $0x108] sm:$0xf0] }
 0x216   : > { %v1110_v43 = vadd.f32 %v1109_v34, %v1000_v11  ;;  %v2184_v28 = vor.u32 %v2278_v0, %v2181_v2  ;;  %v2156_v13 = vor.u32 %v2275_v5, %v2155_v4  ;;  %v2059_v0 = vld [vmem:[#allocation10 + $0x60] sm:$0xf]  ;;  %v2248_v2 = vld [vmem:[#allocation10 + $0x64] sm:$0xf]  ;;  %v2061_v4 = vld [vmem:[#allocation10 + $0x78] sm:$0xf0] }
 0x217   : > { %v1139_v35 = vpop.f32.mrf.mxu3  ;;  %v1264_v15 = vpop.f32.mrf.mxu1  ;;  %v2139_v5 = vld [vmem:[#allocation10 + $0xf8] sm:$0xf] }
 0x218   : > { %v1182_v7 = vpop.f32.mrf.mxu2  ;;  %1656 = vmatpush.bf16.msra.mxu1 %v2184_v28  ;;  %1644 = vmatpush.bf16.msra.mxu0 %v2156_v13  ;;  %v2060_v28 = vor.u32 %v2251_v1, %v2059_v0 }
 0x219   : > { %v1189_v16 = vmax.f32 %v1188_v29, %v1182_v7  ;;  %v2269_v29 = vld [vmem:[#allocation10 + $0x104] sm:$0xf0] }
 0x21a   : > { %v2132_v30 = vor.u32 %v2269_v29, %v2131_v8  ;;  %v2037_v8 = vld [vmem:[#allocation10 + $0x48] sm:$0xf0]  ;;  %v2115_v29 = vld [vmem:[#allocation10 + $0xc8] sm:$0xf] }
 0x21b   : > { %v1190_v44 = vsub.f32 %v3433_v20, %v1189_v16  ;;  %v1193_v45 = vsub.f32 %v1137_v26, %v1189_v16  ;;  %v1196_v47 = vsub.f32 %v3427_v21, %v1189_v16  ;;  %v1199_v50 = vsub.f32 %v3429_v12, %v1189_v16 }
 0x21c   : > { %v1202_v54 = vsub.f32 %v1182_v7, %v1189_v16  ;;  %v2160_v26 = vor.u32 %v2272_v9, %v2157_v14  ;;  %v2266_v7 = vld [vmem:[#allocation10 + $0xf4] sm:$0xf]  ;;  %1645 = vmatpush.bf16.msra.mxu0 %v2132_v30  ;;  %v2270_v9 = vld [vmem:[#allocation10 + $0x10c] sm:$0xf0]  ;;  %v2267_v14 = vld [vmem:[#allocation10 + $0xfc] sm:$0xf] }
 0x21d   : > { %v1191_v51 = vmul.f32 1.442695, %v1190_v44  ;;  %v1194_v52 = vmul.f32 1.442695, %v1193_v45  ;;  %v1197_v53 = vmul.f32 1.442695, %v1196_v47  ;;  %v2136_v44 = vor.u32 %v2266_v7, %v2133_v31 }
 0x21e   : > { %v1200_v56 = vmul.f32 1.442695, %v1199_v50  ;;  %v1203_v57 = vmul.f32 1.442695, %v1202_v54  ;;  %1657 = vmatpush.bf16.msra.mxu1 %v2160_v26  ;;  %v2107_v47 = vld [vmem:[#allocation10 + $0xc0] sm:$0xf]  ;;  %v2140_v13 = vor.u32 %v2270_v9, %v2139_v5 }
 0x21f   : > { %2428 = vpow2.f32 %v1191_v51  ;;  %v2263_v50 = vld [vmem:[#allocation10 + $0xd4] sm:$0xf0]  ;;  %v2260_v51 = vld [vmem:[#allocation10 + $0xc4] sm:$0xf]  ;;  %v2282_v54 = vld [vmem:[#allocation10 + $0x16c] sm:$0xf0] }
 0x220   : > { %v1184_v55 = vpop.f32.mrf.mxu2  ;;  %2430 = vpow2.f32 %v1194_v52  ;;  %v2108_v52 = vor.u32 %v2263_v50, %v2107_v47  ;;  %v2264_v7 = vld [vmem:[#allocation10 + $0xdc] sm:$0xf0] }
 0x221   : > { %2432 = vpow2.f32 %v1197_v53  ;;  %v2109_v53 = vld [vmem:[#allocation10 + $0xd8] sm:$0xf0]  ;;  %v2116_v31 = vor.u32 %v2264_v7, %v2115_v29  ;;  %v2045_v7 = vld [vmem:[#allocation10 + $0x50] sm:$0xf0] }
 0x222   : > { %2434 = vpow2.f32 %v1200_v56  ;;  %1658 = vmatpush.bf16.msra.mxu1 %v2136_v44  ;;  %v2279_v56 = vld [vmem:[#allocation10 + $0x15c] sm:$0xf]  ;;  %1646 = vmatpush.bf16.msra.mxu0 %v2108_v52  ;;  %v2261_v44 = vld [vmem:[#allocation10 + $0xcc] sm:$0xf]  ;;  %v2011_v52 = vld [vmem:[#allocation10] sm:$0xf] }
 0x223   : > { %2436 = vpow2.f32 %v1203_v57  ;;  %v2257_v57 = vld [vmem:[#allocation10 + $0xa4] sm:$0xf0] }
 0x225   : > { %v2429_v22 = vpop.eup %2428 }
 0x226   : > { %v2431_v24 = vpop.eup %2430 }
 0x227   : > { %v1205_v20 = vadd.f32 %v2431_v24, %v2429_v22  ;;  %v2433_v58 = vpop.eup %2432 }
 0x228   : > { %v2435_v21 = vpop.eup %2434 }
 0x229   : > { %v1206_v48 = vadd.f32 %v2433_v58, %v1205_v20  ;;  %v2437_v12 = vpop.eup %2436  ;;  %v2085_v20 = vld [vmem:[#allocation10 + $0xa8] sm:$0xf0] }
 0x22b   : > { %v1207_v49 = vadd.f32 %v2435_v21, %v1206_v48  ;;  %v2276_v48 = vld [vmem:[#allocation10 + $0x13c] sm:$0xf0] }
 0x22d   : > { %v1208_v59 = vadd.f32 %v2437_v12, %v1207_v49 }
 0x22f   : > { %v3451_v38 = vpop.f32.mrf.mxu3  ;;  %2438 = vrcp.f32 %v1208_v59  ;;  %v2165_v59 = vld [vmem:[#allocation10 + $0x140] sm:$0xf0] }
 0x230   : > { %v1296_v62 = vmax.f32 %v3451_v38, %v3439_v27 }
 0x232   : > { %v1297_v26 = vmax.f32 %v1296_v62, %v3442_v6 }
 0x235   : > { %v2439_v11 = vpop.eup %2438 }
 0x236   : > { %v1210_v19 = vmul.f32 0.2, %v2439_v11  ;;  %v2064_v11 = vor.u32 %v2248_v2, %v2061_v4  ;;  %v2252_v2 = vld [vmem:[#allocation10 + $0x7c] sm:$0xf0]  ;;  %v2069_v4 = vld [vmem:[#allocation10 + $0x80] sm:$0xf0] }
 0x237   : > { %v1234_v18 = vpop.f32.mrf.mxu3 }
 0x238   : > { %v3453_v46 = vpop.f32.mrf.mxu2  ;;  %v1211_v3 = vmul.f32 %v2429_v22, %v1210_v19  ;;  %v1213_v10 = vmul.f32 %v2431_v24, %v1210_v19  ;;  %v1215_v63 = vmul.f32 %v2433_v58, %v1210_v19  ;;  %v1217_v23 = vmul.f32 %v2435_v21, %v1210_v19  ;;  %v2254_v22 = vld [vmem:[#allocation10 + $0x94] sm:$0xf]  ;;  %v2163_v58 = vld [vmem:[#allocation10 + $0x128] sm:$0xf] }
 0x239   : > { %v1219_v25 = vmul.f32 %v2437_v12, %v1210_v19  ;;  %v2088_v21 = vor.u32 %v2254_v22, %v2085_v20  ;;  %v2164_v49 = vor.u32 %v2276_v48, %v2163_v58  ;;  %v2273_v12 = vld [vmem:[#allocation10 + $0x12c] sm:$0xf]  ;;  %v2141_v19 = vld [vmem:[#allocation10 + $0x110] sm:$0xf0]  ;;  %v2255_v22 = vld [vmem:[#allocation10 + $0x9c] sm:$0xf] }
 0x23a   : > { %v3455_v33 = vadd.f32 %v1211_v3, %v1102_v36  ;;  %v3457_v34 = vadd.f32 %v1213_v10, %v1104_v37  ;;  %v3460_v16 = vadd.f32 %v1215_v63, %v3446_v17  ;;  %v3462_v35 = vadd.f32 %v1217_v23, %v1108_v41  ;;  %v2187_v36 = vld [vmem:[#allocation10 + $0x158] sm:$0xf]  ;;  %v2189_v17 = vld [vmem:[#allocation10 + $0x170] sm:$0xf0]  ;;  %v2035_v3 = vld [vmem:[#allocation10 + $0x30] sm:$0xf] }
 0x23b   : > { %v3464_v15 = vadd.f32 %v1219_v25, %v1110_v43  ;;  %v2112_v37 = vor.u32 %v2260_v51, %v2109_v53  ;;  %v2188_v55 = vor.u32 %v2282_v54, %v2187_v36  ;;  %v2192_v41 = vor.u32 %v2279_v56, %v2189_v17  ;;  %v2083_v43 = vld [vmem:[#allocation10 + $0x90] sm:$0xf]  ;;  %v2245_v10 = vld [vmem:[#allocation10 + $0x44] sm:$0xf0]  ;;  %v2242_v63 = vld [vmem:[#allocation10 + $0x34] sm:$0xf] }
 0x23c   : > { %v2084_v24 = vor.u32 %v2257_v57, %v2083_v43  ;;  %v2168_v61 = vor.u32 %v2273_v12, %v2165_v59  ;;  %v2144_v18 = vor.u32 %v2267_v14, %v2141_v19  ;;  %v2036_v23 = vor.u32 %v2245_v10, %v2035_v3  ;;  %v2239_v53 = vld [vmem:[#allocation10 + $0x14] sm:$0xf0]  ;;  %v2236_v36 = vld [vmem:[#allocation10 + $0x4] sm:$0xf]  ;;  %v2258_v56 = vld [vmem:[#allocation10 + $0xac] sm:$0xf0] }
 0x23d   : > { %1669 = vmatpush.bf16.msra.mxu2 %v2188_v55  ;;  %1659 = vmatpush.bf16.msra.mxu1 %v2112_v37  ;;  %v1298_v25 = vmax.f32 %v1297_v26, %v3453_v46  ;;  %v2040_v30 = vor.u32 %v2242_v63, %v2037_v8  ;;  %v2012_v54 = vor.u32 %v2239_v53, %v2011_v52  ;;  %v2013_v37 = vld [vmem:[#allocation10 + $0x18] sm:$0xf0]  ;;  %v2091_v55 = vld [vmem:[#allocation10 + $0x98] sm:$0xf]  ;;  %v2195_v20 = vld [vmem:[#allocation10 + $0x160] sm:$0xf] }
 0x23e   : > { %1682 = vmatpush.bf16.msra.mxu3 %v2192_v41  ;;  %1647 = vmatpush.bf16.msra.mxu0 %v2084_v24  ;;  %v2093_v24 = vld [vmem:[#allocation10 + $0xb0] sm:$0xf0]  ;;  %v2016_v58 = vor.u32 %v2236_v36, %v2013_v37  ;;  %v2092_v48 = vor.u32 %v2258_v56, %v2091_v55  ;;  %v2280_v12 = vld [vmem:[#allocation10 + $0x164] sm:$0xf]  ;;  %v2197_v59 = vld [vmem:[#allocation10 + $0x178] sm:$0xf0] }
 0x23f   : > { %v2277_v14 = vld [vmem:[#allocation10 + $0x144] sm:$0xf0]  ;;  %v2274_v19 = vld [vmem:[#allocation10 + $0x134] sm:$0xf]  ;;  %v2173_v3 = vld [vmem:[#allocation10 + $0x148] sm:$0xf0] }
 0x240   : > { %v1279_v45 = vpop.f32.mrf.mxu2  ;;  %v2176_v10 = vor.u32 %v2274_v19, %v2173_v3  ;;  %v2043_v63 = vld [vmem:[#allocation10 + $0x38] sm:$0xf]  ;;  %v2243_v8 = vld [vmem:[#allocation10 + $0x3c] sm:$0xf]  ;;  %v2019_v53 = vld [vmem:[#allocation10 + $0x8] sm:$0xf] }
 0x241   : > { %1670 = vmatpush.bf16.msra.mxu2 %v2164_v49  ;;  %1660 = vmatpush.bf16.msra.mxu1 %v2088_v21  ;;  %v2117_v45 = vld [vmem:[#allocation10 + $0xe0] sm:$0xf0]  ;;  %v2096_v21 = vor.u32 %v2255_v22, %v2093_v24  ;;  %v2283_v49 = vld [vmem:[#allocation10 + $0x174] sm:$0xf0]  ;;  %v2240_v36 = vld [vmem:[#allocation10 + $0x1c] sm:$0xf0] }
 0x242   : > { %1683 = vmatpush.bf16.msra.mxu3 %v2168_v61  ;;  %1648 = vmatpush.bf16.msra.mxu0 %v2060_v28  ;;  %v2120_v50 = vor.u32 %v2261_v44, %v2117_v45  ;;  %v2249_v28 = vld [vmem:[#allocation10 + $0x6c] sm:$0xf]  ;;  %v2268_v45 = vld [vmem:[#allocation10 + $0x104] sm:$0xf]  ;;  %v2020_v55 = vor.u32 %v2240_v36, %v2019_v53  ;;  %v2262_v24 = vld [vmem:[#allocation10 + $0xd4] sm:$0xf] }
 0x243   : > { %v2021_v56 = vld [vmem:[#allocation10 + $0x20] sm:$0xf0]  ;;  %v2241_v3 = vld [vmem:[#allocation10 + $0x24] sm:$0xf0] }
 0x245   : > { %1671 = vmatpush.bf16.msra.mxu2 %v2140_v13  ;;  %1661 = vmatpush.bf16.msra.mxu1 %v2064_v11  ;;  %v2072_v11 = vor.u32 %v2249_v28, %v2069_v4  ;;  %v2171_v13 = vld [vmem:[#allocation10 + $0x130] sm:$0xf]  ;;  %v2077_v28 = vld [vmem:[#allocation10 + $0x88] sm:$0xf0] }
 0x246   : > { %1684 = vmatpush.bf16.msra.mxu3 %v2144_v18  ;;  %1649 = vmatpush.bf16.msra.mxu0 %v2036_v23  ;;  %v2172_v26 = vor.u32 %v2277_v14, %v2171_v13  ;;  %v2246_v23 = vld [vmem:[#allocation10 + $0x4c] sm:$0xf0]  ;;  %v2244_v13 = vld [vmem:[#allocation10 + $0x44] sm:$0xf]  ;;  %v2053_v14 = vld [vmem:[#allocation10 + $0x58] sm:$0xf0] }
 0x247   : > { %v2044_v29 = vor.u32 %v2246_v23, %v2043_v63  ;;  %v2029_v63 = vld [vmem:[#allocation10 + $0x28] sm:$0xf0] }
 0x249   : > { %1672 = vmatpush.bf16.msra.mxu2 %v2116_v31  ;;  %1662 = vmatpush.bf16.msra.mxu1 %v2040_v30  ;;  %v2271_v30 = vld [vmem:[#allocation10 + $0x114] sm:$0xf0]  ;;  %v2048_v31 = vor.u32 %v2243_v8, %v2045_v7 }
 0x24a   : > { %1685 = vmatpush.bf16.msra.mxu3 %v2120_v50  ;;  %1650 = vmatpush.bf16.msra.mxu0 %v2012_v54  ;;  %v2237_v54 = vld [vmem:[#allocation10 + $0xc] sm:$0xf] }
 0x24d   : > { %1663 = vmatpush.bf16.msra.mxu1 %v2016_v58  ;;  %1673 = vmatpush.bf16.msra.mxu2 %v2092_v48 }
 0x24e   : > { %1686 = vmatpush.bf16.msra.mxu3 %v2096_v21  ;;  %v2099_v21 = vld [vmem:[#allocation10 + $0xa0] sm:$0xf] }
 0x24f   : > { %v1292_v47 = vpop.f32.mrf.mxu3 }
 0x250   : > { %v1299_v51 = vmax.f32 %v1298_v25, %v1292_v47  ;;  %v2147_v25 = vld [vmem:[#allocation10 + $0x100] sm:$0xf] }
 0x251   : > { %v2148_v44 = vor.u32 %v2271_v30, %v2147_v25 }
 0x252   : > { %v1300_v17 = vsub.f32 %v3451_v38, %v1299_v51  ;;  %v1303_v41 = vsub.f32 %v3439_v27, %v1299_v51  ;;  %v1306_v43 = vsub.f32 %v3442_v6, %v1299_v51  ;;  %v1309_v57 = vsub.f32 %v3453_v46, %v1299_v51  ;;  %v2067_v46 = vld [vmem:[#allocation10 + $0x68] sm:$0xf]  ;;  %1687 = vmatpush.bf16.msra.mxu3 %v2072_v11  ;;  %v2247_v11 = vld [vmem:[#allocation10 + $0x54] sm:$0xf0] }
 0x253   : > { %v1312_v0 = vsub.f32 %v1292_v47, %v1299_v51  ;;  %v2196_v38 = vor.u32 %v2283_v49, %v2195_v20  ;;  %v2200_v6 = vor.u32 %v2280_v12, %v2197_v59  ;;  %v2068_v9 = vor.u32 %v2252_v2, %v2067_v46  ;;  %v2149_v47 = vld [vmem:[#allocation10 + $0x118] sm:$0xf0]  ;;  %v2125_v20 = vld [vmem:[#allocation10 + $0xe8] sm:$0xf0]  ;;  %v2259_v49 = vld [vmem:[#allocation10 + $0xb4] sm:$0xf0] }
 0x254   : > { %v1301_v61 = vmul.f32 1.442695, %v1300_v17  ;;  %v1304_v62 = vmul.f32 1.442695, %v1303_v41  ;;  %v1307_v1 = vmul.f32 1.442695, %v1306_v43  ;;  %v2152_v51 = vor.u32 %v2268_v45, %v2149_v47 }
 0x255   : > { %v1310_v27 = vmul.f32 1.442695, %v1309_v57  ;;  %1695 = vmatpush.bf16.msrb.mxu0 %v2196_v38  ;;  %1708 = vmatpush.bf16.msrb.mxu1 %v2200_v6  ;;  %v1313_v18 = vmul.f32 1.442695, %v1312_v0  ;;  %v2123_v17 = vld [vmem:[#allocation10 + $0xd0] sm:$0xf]  ;;  %v2024_v57 = vor.u32 %v2237_v54, %v2021_v56  ;;  %v2128_v48 = vor.u32 %v2262_v24, %v2125_v20 }
 0x256   : > { %2440 = vpow2.f32 %v1301_v61  ;;  %1674 = vmatpush.bf16.msra.mxu2 %v2068_v9  ;;  %1688 = vmatpush.bf16.msra.mxu3 %v2048_v31  ;;  %v2265_v41 = vld [vmem:[#allocation10 + $0xe4] sm:$0xf0]  ;;  %v2256_v12 = vld [vmem:[#allocation10 + $0xa4] sm:$0xf]  ;;  %v2101_v61 = vld [vmem:[#allocation10 + $0xb8] sm:$0xf0]  ;;  %v2100_v0 = vor.u32 %v2259_v49, %v2099_v21 }
 0x257   : > { %2442 = vpow2.f32 %v1304_v62  ;;  %v1294_v5 = vpop.f32.mrf.mxu3  ;;  %v2124_v22 = vor.u32 %v2265_v41, %v2123_v17  ;;  %v2253_v6 = vld [vmem:[#allocation10 + $0x84] sm:$0xf0]  ;;  %v2250_v2 = vld [vmem:[#allocation10 + $0x74] sm:$0xf]  ;;  %v2051_v9 = vld [vmem:[#allocation10 + $0x40] sm:$0xf] }
 0x258   : > { %2444 = vpow2.f32 %v1307_v1  ;;  %v2104_v1 = vor.u32 %v2256_v12, %v2101_v61  ;;  %v2080_v5 = vor.u32 %v2250_v2, %v2077_v28  ;;  %v2052_v19 = vor.u32 %v2247_v11, %v2051_v9 }
 0x259   : > { %1696 = vmatpush.bf16.msrb.mxu0 %v2172_v26  ;;  %2446 = vpow2.f32 %v1310_v27  ;;  %1709 = vmatpush.bf16.msrb.mxu1 %v2176_v10  ;;  %v2075_v27 = vld [vmem:[#allocation10 + $0x70] sm:$0xf]  ;;  %v2056_v26 = vor.u32 %v2244_v13, %v2053_v14  ;;  %v2238_v10 = vld [vmem:[#allocation10 + $0x14] sm:$0xf] }
 0x25a   : > { %2448 = vpow2.f32 %v1313_v18  ;;  %1675 = vmatpush.bf16.msra.mxu2 %v2044_v29  ;;  %1689 = vmatpush.bf16.msra.mxu3 %v2024_v57  ;;  %v2076_v4 = vor.u32 %v2253_v6, %v2075_v27  ;;  %v2027_v18 = vld [vmem:[#allocation10 + $0x10] sm:$0xf]  ;;  %v2032_v7 = vor.u32 %v2238_v10, %v2029_v63 }
 0x25b   : > { %v2028_v29 = vor.u32 %v2241_v3, %v2027_v18 }
 0x25c   : > { %v3474_v50 = vpop.eup %2440 }
 0x25d   : > { %v2443_v52 = vpop.eup %2442  ;;  %1697 = vmatpush.bf16.msrb.mxu0 %v2148_v44  ;;  %1710 = vmatpush.bf16.msrb.mxu1 %v2152_v51 }
 0x25e   : > { %v1315_v37 = vadd.f32 %v2443_v52, %v3474_v50  ;;  %v2445_v43 = vpop.eup %2444  ;;  %1676 = vmatpush.bf16.msra.mxu2 %v2020_v55 }
 0x25f   : > { %v2447_v59 = vpop.eup %2446 }
 0x260   : > { %v1316_v58 = vadd.f32 %v2445_v43, %v1315_v37  ;;  %v2449_v38 = vpop.eup %2448 }
 0x261   : > { %1698 = vmatpush.bf16.msrb.mxu0 %v2124_v22  ;;  %1711 = vmatpush.bf16.msrb.mxu1 %v2128_v48 }
 0x262   : > { %v1317_v62 = vadd.f32 %v2447_v59, %v1316_v58 }
 0x264   : > { %v1318_v46 = vadd.f32 %v2449_v38, %v1317_v62 }
 0x265   : > { %1699 = vmatpush.bf16.msrb.mxu0 %v2100_v0  ;;  %1712 = vmatpush.bf16.msrb.mxu1 %v2104_v1 }
 0x266   : > { %2450 = vrcp.f32 %v1318_v46 }
 0x269   : > { %1700 = vmatpush.bf16.msrb.mxu0 %v2076_v4  ;;  %1713 = vmatpush.bf16.msrb.mxu1 %v2080_v5 }
 0x26c   : > { %v2451_v23 = vpop.eup %2450 }
 0x26d   : > { %v1320_v8 = vmul.f32 0.2, %v2451_v23  ;;  %1701 = vmatpush.bf16.msrb.mxu0 %v2052_v19  ;;  %1714 = vmatpush.bf16.msrb.mxu1 %v2056_v26 }
 0x26f   : > { %v1321_v25 = vmul.f32 %v3474_v50, %v1320_v8  ;;  %v1323_v30 = vmul.f32 %v2443_v52, %v1320_v8  ;;  %v1325_v31 = vmul.f32 %v2445_v43, %v1320_v8  ;;  %v1327_v44 = vmul.f32 %v2447_v59, %v1320_v8 }
 0x270   : > { %v1329_v45 = vmul.f32 %v2449_v38, %v1320_v8 }
 0x271   : > { %v1322_v47 = vadd.f32 %v1321_v25, %v3455_v33  ;;  %v1324_v51 = vadd.f32 %v1323_v30, %v3457_v34  ;;  %v1326_v53 = vadd.f32 %v1325_v31, %v3460_v16  ;;  %v1328_v36 = vadd.f32 %v1327_v44, %v3462_v35  ;;  %1702 = vmatpush.bf16.msrb.mxu0 %v2028_v29 }
 0x272   : > { %v1330_v54 = vadd.f32 %v1329_v45, %v3464_v15  ;;  %1715 = vmatpush.bf16.msrb.mxu1 %v2032_v7 }
 0x273   : > { %v1331_v37 = vmul.f32 %v1322_v47, %v3162_v32  ;;  %v1332_v50 = vmul.f32 %v1324_v51, %v3187_v42  ;;  %v1334_v52 = vmul.f32 %v1326_v53, %v3217_v60  ;;  %v1336_v55 = vmul.f32 %v1328_v36, %v3292_v40  ;;  %v1389_v32 = vld [vmem:[#allocation11] sm:$0x3f] }
 0x274   : > { %v1338_v33 = vmul.f32 %v1330_v54, %v3368_v39  ;;  %v1391_v42 = vperm.slane %v1389_v32, 0  ;;  %v1392_v60 = vperm.slane %v1389_v32, 1  ;;  %v1393_v43 = vperm.slane %v1389_v32, 2 }
 0x275   : > { %v1333_v34 = vadd.f32 %v1332_v50, %v1331_v37  ;;  %v1394_v57 = vperm.slane %v1389_v32, 3  ;;  %v1395_v49 = vperm.slane %v1389_v32, 4  ;;  %v1396_v12 = vperm.slane %v1389_v32, 5 }
 0x277   : > { %v1335_v56 = vadd.f32 %v1334_v52, %v1333_v34 }
 0x279   : > { %v1337_v16 = vadd.f32 %v1336_v55, %v1335_v56 }
 0x27b   : > { %v1339_v17 = vadd.f32 %v1338_v33, %v1337_v16 }
 0x27d   : > { %v1340_v35 = vpack.c.bf16 %v1339_v17, %v1339_v17 }
 0x27f   : > { %1651 = vmatmul.bf16.vlgmr.msra.gmra.mxu0 %v1340_v35  ;;  %1664 = vmatmul.bf16.vlgmr.msra.gmra.mxu1 %v1340_v35 }
 0x280   : > { %1677 = vmatmul.bf16.vlgmr.msra.gmra.mxu2 %v1340_v35  ;;  %1690 = vmatmul.bf16.vlgmr.msra.gmra.mxu3 %v1340_v35 }
 0x28f   : > { %1703 = vmatmul.bf16.vlgmr.msrb.gmra.mxu0 %v1340_v35  ;;  %1716 = vmatmul.bf16.vlgmr.msrb.gmra.mxu1 %v1340_v35 }
 0x2fc   : > { %v1652_v40 = vpop.f32.mrf.mxu0  ;;  %v1665_v15 = vpop.f32.mrf.mxu1 }
 0x2fd   : > { %v1653_v41 = vadd.f32 %v1652_v40, %v1391_v42  ;;  %v1666_v39 = vadd.f32 %v1665_v15, %v1392_v60 }
 0x2ff   : > { %1721 = vst [vmem:[%s349_s8] sm:$0xff] %v1653_v41 }
 0x300   : > { %1722 = vst [vmem:[%s349_s8 + $0x8] sm:$0xff] %v1666_v39 }
 0x303   : > { %v1678_v22 = vpop.f32.mrf.mxu2  ;;  %v1691_v24 = vpop.f32.mrf.mxu3 }
 0x304   : > { %v1679_v20 = vadd.f32 %v1678_v22, %v1393_v43  ;;  %v1692_v58 = vadd.f32 %v1691_v24, %v1394_v57  ;;  %v1654_v48 = vpop.f32.mrf.mxu0  ;;  %v1667_v21 = vpop.f32.mrf.mxu1 }
 0x306   : > { %1723 = vst [vmem:[%s349_s8 + $0x10] sm:$0xff] %v1679_v20 }
 0x307   : > { %1724 = vst [vmem:[%s349_s8 + $0x18] sm:$0xff] %v1692_v58 }
 0x30b   : > { %v1680_v59 = vpop.f32.mrf.mxu2  ;;  %v1693_v61 = vpop.f32.mrf.mxu3 }
 0x30c   : > { %v1704_v62 = vpop.f32.mrf.mxu0  ;;  %v1717_v0 = vpop.f32.mrf.mxu1 }
 0x30d   : > { %v1705_v38 = vadd.f32 %v1704_v62, %v1395_v49  ;;  %v1718_v1 = vadd.f32 %v1717_v0, %v1396_v12 }
 0x30f   : > { %1725 = vst [vmem:[%s349_s8 + $0x20] sm:$0xff] %v1705_v38 }
 0x310   : > { %1726 = vst [vmem:[%s349_s8 + $0x28] sm:$0xff] %v1718_v1 }
 0x311   : > { %2659 = shalt.err (!%p2656_p10)
}
 0x312   : > { %2310 = dma.vmem_to_hbm [thread:$0]  (%p2855_p7), %s1742_s10, 768, %s1744_s11, %s1728_s25  }
 0x314   : > { %v1706_v27 = vpop.f32.mrf.mxu0  ;;  %v1719_v6 = vpop.f32.mrf.mxu1 }
 0x315 PF: > { %s1755_s9 = sand.u32 1, %s2698_s21   ;;  %p3543_p12 = scmp.ge.s32.totalorder %s2710_s24, 2 }
 0x316   : > { %s1756_s19 = scalar_lea.sflag [#allocation4], %s1755_s9 }
 0x317   : > { %p2333_p13 = pnand %p3543_p12, %p2794_p6 }
 0x319   : > { %p2334_p0 = pneg %p2333_p13 }
 0x31b   : > { %2693 = dma.done.wait (%p2334_p0), %s1756_s19, 768  }
 0x31c   : > { %2695 = vsyncadd (%p2334_p0), %s1756_s19, 4294966528  ;;  %p22_p7 = scmp.ge.s32.totalorder %s2841_s12, 4   ;;  %s3544_s21 = smov %s2702_s22 }
 0x31d   : > { %s3545_s22 = smov %s2706_s23  ;;  %s3546_s23 = smov %s2851_s13 }
 0x31e   : > { %s3547_s24 = smov %s2841_s12  ;;  %24 = sbr.rel (!%p22_p7) target bundleno = 11 (0xb), region = 113 }
 0x323   :  { %1762 = vsyncpa [#allocation3], 1 }
 0x324   :  { %1764 = vsyncpa [#allocation3 + $0x1], 1 }
 0x325   :  { %1765 = vsyncpa [#allocation6], 1 }
 0x326   :  { %1766 = vsyncpa [#allocation9], 1 }
 0x327   :  { %1767 = vsyncpa [#allocation12], 1 }
 0x328   :  { %1768 = vsyncpa [#allocation4], 1 }
 0x329   :  { %1770 = vsyncpa [#allocation4 + $0x1], 1 }

</bundles_post_ra>
